<compile_context>
chip_gen: v7x
topology: tpu7x:2x2x1
jax: 0.10.0
libtpu: 0.0.40
codegen_flags: <defaults>
</compile_context>

<pallas_src>
import functools

import jax
import jax.numpy as jnp
from jax.experimental import pallas as pl
from jax.experimental.pallas import tpu as pltpu


# ----------------------------------------------------------------------------
# Fused kernel: all SAGEConv layers, grid = (layer, node-row-tile)
# ----------------------------------------------------------------------------
def sage_gcn_kernel(adj_ref, x_ref, wl_ref, wr_ref, b_ref, invdeg_ref,
                    out_ref, act_ref, *, tile_m, num_nodes):
    l = pl.program_id(0)                 # layer index (outer, sequential)
    i = pl.program_id(1)                 # node-row tile index
    num_layers = pl.num_programs(0)
    row0 = pl.multiple_of(i * tile_m, tile_m)

    # Streamed row tile of the integer edge-count adjacency (exact in bf16)
    # and the per-row f32 mean-normalization scale.
    adj = adj_ref[...].astype(jnp.bfloat16)          # (tm, Npad)
    inv_deg = invdeg_ref[...]                        # (tm, 1) f32

    def run(x_full, x_self, dst):
        # Mean aggregation: exact-count matmul, then per-row f32 1/deg scale.
        agg = jnp.dot(adj, x_full, preferred_element_type=jnp.float32) * inv_deg
        # SAGEConv: agg @ W_l + x_self @ W_r + b, then ReLU (two K=F MXU dots,
        # no concat copy).
        h = jnp.dot(agg.astype(jnp.bfloat16), wl_ref[...],
                    preferred_element_type=jnp.float32)
        h = h + jnp.dot(x_self, wr_ref[...], preferred_element_type=jnp.float32)
        h = jnp.maximum(h + b_ref[...], 0.0)
        # Zero padded rows so relu(b) garbage never enters later layers.
        rows = row0 + jax.lax.broadcasted_iota(jnp.int32, h.shape, 0)
        h = jnp.where(rows < num_nodes, h, 0.0)

        # Keep the activation resident (bf16) for the next layer only.
        @pl.when(l < num_layers - 1)
        def _():
            act_ref[dst, pl.ds(row0, tile_m), :] = h.astype(jnp.bfloat16)

        # The resident output block is written once, by the last layer.
        @pl.when(l == num_layers - 1)
        def _():
            out_ref[pl.ds(row0, tile_m), :] = h

    # Layer 0 reads the (resident, bf16) padded input directly — no seed copy.
    @pl.when(l == 0)
    def _():
        run(x_ref[...], x_ref[pl.ds(row0, tile_m), :], 0)

    # Layer l >= 1 reads slot (l - 1) % 2 and writes slot l % 2.
    @pl.when(jnp.logical_and(l > 0, l % 2 == 1))
    def _():
        run(act_ref[0], act_ref[0, pl.ds(row0, tile_m), :], 1)

    @pl.when(jnp.logical_and(l > 0, l % 2 == 0))
    def _():
        run(act_ref[1], act_ref[1, pl.ds(row0, tile_m), :], 0)


def _estimate_vmem_bytes(n_pad, f_pad, tile_m):
    # Conservative: count double buffers even for constant-index blocks.
    b = 0
    b += 2 * tile_m * n_pad * 1          # adjacency row tiles (int8)
    b += 2 * n_pad * f_pad * 2           # resident padded input (bf16)
    b += 2 * 2 * f_pad * f_pad * 2       # W_l + W_r per layer (bf16)
    b += 2 * 1 * f_pad * 4               # bias (f32)
    b += 2 * tile_m * 4                  # inv_deg row tiles (f32)
    b += 2 * n_pad * f_pad * 4           # resident output (f32)
    b += 2 * n_pad * f_pad * 2           # ping-pong activation scratch (bf16)
    return b


def _sage_gcn_forward(adj_pad, x_pad, wl_stack, wr_stack, b_stack, invdeg_pad,
                      *, num_layers, tile_m, num_nodes):
    n_pad = adj_pad.shape[0]
    f_pad = x_pad.shape[1]
    grid = (num_layers, n_pad // tile_m)
    kernel = functools.partial(sage_gcn_kernel, tile_m=tile_m,
                               num_nodes=num_nodes)
    # Explicit VMEM budget: headroom over the estimate, but never above the
    # v7x per-core physical ceiling of 64 MiB (v5e/v6e have 128 MiB).
    vmem_limit = min(max(4 * _estimate_vmem_bytes(n_pad, f_pad, tile_m),
                         32 * 1024 * 1024),
                     64 * 1024 * 1024)
    return pl.pallas_call(
        kernel,
        out_shape=jax.ShapeDtypeStruct((n_pad, f_pad), jnp.float32),
        grid_spec=pltpu.PrefetchScalarGridSpec(
            num_scalar_prefetch=0,
            grid=grid,
            in_specs=[
                # Row tile of the int8 edge-count adjacency: (tile_m, Npad).
                pl.BlockSpec((tile_m, n_pad), lambda l, i: (i, 0)),
                # Padded bf16 input features: constant index -> fetched once.
                pl.BlockSpec((n_pad, f_pad), lambda l, i: (0, 0)),
                # W_l per layer: (F, F) bf16; squeezed layer dim.
                pl.BlockSpec((None, f_pad, f_pad), lambda l, i: (l, 0, 0)),
                # W_r per layer: (F, F) bf16; squeezed layer dim.
                pl.BlockSpec((None, f_pad, f_pad), lambda l, i: (l, 0, 0)),
                # Bias per layer: (1, F) f32; squeezed layer dim.
                pl.BlockSpec((None, 1, f_pad), lambda l, i: (l, 0, 0)),
                # Per-row 1/deg scale: (tile_m, 1) f32, row-tiled.
                pl.BlockSpec((tile_m, 1), lambda l, i: (i, 0)),
            ],
            # Full-array output block with constant index map: stays resident
            # in VMEM and is written back to HBM exactly once at grid end.
            out_specs=pl.BlockSpec((n_pad, f_pad), lambda l, i: (0, 0)),
            scratch_shapes=[
                # Ping-pong activation buffer, bf16, persists across the grid.
                pltpu.VMEM((2, n_pad, f_pad), jnp.bfloat16),
            ],
        ),
        compiler_params=pltpu.CompilerParams(
            # Both axes must be "arbitrary": the activation scratch carries a
            # dependency from every step of layer l into every step of l+1.
            dimension_semantics=("arbitrary", "arbitrary"),
            vmem_limit_bytes=int(vmem_limit),
        ),
    )(adj_pad, x_pad, wl_stack, wr_stack, b_stack, invdeg_pad)


sage_gcn_forward = jax.jit(
    _sage_gcn_forward, static_argnames=("num_layers", "tile_m", "num_nodes"))


# ----------------------------------------------------------------------------
# Plain-JAX glue: adjacency, parameter packing, padding, f32 reference
# ----------------------------------------------------------------------------
def build_adjacency(edge_index, num_nodes):
    # counts[i, j] = number of edges j -> i ; inv_deg[i] = 1 / in_degree(i).
    src, dst = edge_index[0], edge_index[1]
    counts = jnp.zeros((num_nodes, num_nodes), jnp.float32).at[dst, src].add(1.0)
    deg = counts.sum(axis=1, keepdims=True)
    inv_deg = jnp.where(deg > 0, 1.0 / jnp.maximum(deg, 1.0), 0.0)
    return counts, inv_deg


def pack_sage_layer(wl, wr, b, f_pad):
    in_f, out_f = wl.shape
    wl_pad = jnp.zeros((f_pad, f_pad), jnp.float32).at[:in_f, :out_f].set(wl)
    wr_pad = jnp.zeros((f_pad, f_pad), jnp.float32).at[:in_f, :out_f].set(wr)
    b_pad = jnp.zeros((1, f_pad), jnp.float32).at[0, :out_f].set(b)
    return wl_pad, wr_pad, b_pad


def _round_up(x, m):
    return ((x + m - 1) // m) * m


def sage_gcn_reference(adj_mean, x, layers):
    # Pure-JAX f32 reference with identical semantics.
    h = x
    for wl, wr, b in layers:
        agg = adj_mean @ h
        h = jnp.maximum(agg @ wl + h @ wr + b[None, :], 0.0)
    return h


# ----------------------------------------------------------------------------
if __name__ == "__main__":
    num_layers = 3
    num_nodes = 200
    in_f, hid_f, out_f = 16, 32, 24
    F_PAD = 128          # lane-dense feature width
    TILE_M = 128         # node-row tile (MXU / sublane friendly)

    key = jax.random.PRNGKey(0)
    k_par, k_x, k_e1, k_e2 = jax.random.split(key, 4)

    # ---- parameters (PyG SAGEConv: lin_l has bias, lin_r has none) ----------
    dims = [(in_f, hid_f)] + [(hid_f, hid_f)] * (num_layers - 2) + [(hid_f, out_f)]
    layer_keys = jax.random.split(k_par, num_layers)
    layers = []
    for li, (fi, fo) in enumerate(dims):
        kwl, kwr, kb = jax.random.split(layer_keys[li], 3)
        bound = 1.0 / (fi ** 0.5)
        wl = jax.random.uniform(kwl, (fi, fo), jnp.float32, -bound, bound)
        wr = jax.random.uniform(kwr, (fi, fo), jnp.float32, -bound, bound)
        b = jax.random.uniform(kb, (fo,), jnp.float32, -bound, bound)
        layers.append((wl, wr, b))

    # ---- graph + node features ----------------------------------------------
    x = jax.random.normal(k_x, (num_nodes, in_f), jnp.float32)
    ring_src = jnp.arange(num_nodes, dtype=jnp.int32)
    ring_dst = (ring_src + 1) % num_nodes
    n_extra = 256
    extra_src = jax.random.randint(k_e1, (n_extra,), 0, num_nodes, jnp.int32)
    extra_dst = jax.random.randint(k_e2, (n_extra,), 0, num_nodes, jnp.int32)
    edge_index = jnp.stack([jnp.concatenate([ring_src, extra_src]),
                            jnp.concatenate([ring_dst, extra_dst])])

    # Adjacency is built ONCE (static graph) — hoisted out of the forward pass.
    counts, inv_deg = build_adjacency(edge_index, num_nodes)

    # ---- pad / pack for the fused kernel ------------------------------------
    n_pad = _round_up(num_nodes, TILE_M)
    # Exact small-integer edge counts in int8 (counts here are < 127).
    adj_pad = (jnp.zeros((n_pad, n_pad), jnp.int8)
               .at[:num_nodes, :num_nodes].set(counts.astype(jnp.int8)))
    invdeg_pad = (jnp.zeros((n_pad, 1), jnp.float32)
                  .at[:num_nodes, :].set(inv_deg))
    x_pad = (jnp.zeros((n_pad, F_PAD), jnp.float32)
             .at[:num_nodes, :in_f].set(x)).astype(jnp.bfloat16)

    wl_list, wr_list, b_list = [], [], []
    for wl, wr, b in layers:
        wl_pad, wr_pad, b_pad = pack_sage_layer(wl, wr, b, F_PAD)
        wl_list.append(wl_pad)
        wr_list.append(wr_pad)
        b_list.append(b_pad)
    wl_stack = jnp.stack(wl_list).astype(jnp.bfloat16)   # (L, F_PAD, F_PAD)
    wr_stack = jnp.stack(wr_list).astype(jnp.bfloat16)   # (L, F_PAD, F_PAD)
    b_stack = jnp.stack(b_list)                          # (L, 1, F_PAD) f32

    # ---- run fused kernel ----------------------------------------------------
    out_pad = sage_gcn_forward(adj_pad, x_pad, wl_stack, wr_stack, b_stack,
                               invdeg_pad, num_layers=num_layers,
                               tile_m=TILE_M, num_nodes=num_nodes)
    out = out_pad[:num_nodes, :out_f]
    jax.block_until_ready(out)

    # ---- check against the f32 reference (bf16 operands -> loose tolerance) --
    adj_mean = counts * inv_deg
    ref = sage_gcn_reference(adj_mean, x, layers)
    assert out.shape == (num_nodes, out_f)
    assert bool(jnp.isfinite(out).all())
    assert bool(jnp.allclose(out, ref, rtol=8e-2, atol=8e-2)), (
        f"max abs err = {float(jnp.max(jnp.abs(out - ref)))}")
    print("KERNEL_OK")
</pallas_src>

<mosaic_0001>
module attributes {stable_mosaic.version = 11 : i64} {
  func.func @sage_gcn_kernel(%arg0: i32, %arg1: i32, %arg2: memref<128x256xi8, #tpu.memory_space<vmem>>, %arg3: memref<256x128xbf16, #tpu.memory_space<vmem>>, %arg4: memref<1x128x128xbf16, #tpu.memory_space<vmem>>, %arg5: memref<1x128x128xbf16, #tpu.memory_space<vmem>>, %arg6: memref<1x1x128xf32, #tpu.memory_space<vmem>>, %arg7: memref<128x1xf32, #tpu.memory_space<vmem>>, %arg8: memref<256x128xf32, #tpu.memory_space<vmem>>, %arg9: memref<2x256x128xbf16, #tpu.memory_space<vmem>>) attributes {dimension_semantics = [#tpu.dimension_semantics<arbitrary>, #tpu.dimension_semantics<arbitrary>], iteration_bounds = array<i64: 3, 2>, scalar_prefetch = 0 : i64, scratch_operands = 1 : i64, tpu.core_type = #tpu.core_type<tc>, window_params = [{transform_indices = @transform_0, window_bounds = array<i64: 128, 256>}, {pipeline_mode = #tpu.pipeline_mode<synchronous>, transform_indices = @transform_1, window_bounds = array<i64: 256, 128>}, {transform_indices = @transform_2, window_bounds = array<i64: 1, 128, 128>}, {transform_indices = @transform_3, window_bounds = array<i64: 1, 128, 128>}, {transform_indices = @transform_4, window_bounds = array<i64: 1, 1, 128>}, {transform_indices = @transform_5, window_bounds = array<i64: 128, 1>}, {pipeline_mode = #tpu.pipeline_mode<synchronous>, transform_indices = @transform_6, window_bounds = array<i64: 256, 128>}]} {
    %c128_i32 = arith.constant 128 : i32
    %0 = arith.muli %arg1, %c128_i32 : i32
    %1 = tpu.assume_multiple %0, 128 : i32
    %c0 = arith.constant 0 : index
    %c0_0 = arith.constant 0 : index
    %2 = vector.load %arg2[%c0, %c0_0] : memref<128x256xi8, #tpu.memory_space<vmem>>, vector<128x256xi8>
    %3 = arith.sitofp %2 : vector<128x256xi8> to vector<128x256xbf16>
    %c0_1 = arith.constant 0 : index
    %c0_2 = arith.constant 0 : index
    %4 = vector.load %arg7[%c0_1, %c0_2] : memref<128x1xf32, #tpu.memory_space<vmem>>, vector<128x1xf32>
    %c0_i32 = arith.constant 0 : i32
    %5 = arith.cmpi eq, %arg0, %c0_i32 : i32
    %6 = arith.extui %5 : i1 to i32
    %c0_i32_3 = arith.constant 0 : i32
    %7 = arith.cmpi ne, %6, %c0_i32_3 : i32
    scf.if %7 {
      %c0_20 = arith.constant 0 : index
      %c0_21 = arith.constant 0 : index
      %38 = vector.load %arg3[%c0_20, %c0_21] : memref<256x128xbf16, #tpu.memory_space<vmem>>, vector<256x128xbf16>
      %39 = arith.index_cast %1 : i32 to index
      %c0_22 = arith.constant 0 : index
      %40 = vector.load %arg3[%39, %c0_22] : memref<256x128xbf16, #tpu.memory_space<vmem>>, vector<128x128xbf16>
      %cst = arith.constant dense<0.000000e+00> : vector<128x128xf32>
      %41 = tpu.matmul %3, %38, %cst {dimension_numbers = #tpu.dot_dimension_numbers<[1], [0], [0], [1], [0, 0, 1, 1], [], []>} : vector<128x256xbf16>, vector<256x128xbf16>, vector<128x128xf32> -> vector<128x128xf32>
      %42 = vector.broadcast %4 : vector<128x1xf32> to vector<128x128xf32>
      %43 = arith.mulf %41, %42 : vector<128x128xf32>
      %44 = arith.truncf %43 : vector<128x128xf32> to vector<128x128xbf16>
      %c0_23 = arith.constant 0 : index
      %c0_24 = arith.constant 0 : index
      %c0_25 = arith.constant 0 : index
      %45 = vector.load %arg4[%c0_23, %c0_24, %c0_25] : memref<1x128x128xbf16, #tpu.memory_space<vmem>>, vector<1x128x128xbf16>
      %46 = vector.shape_cast %45 : vector<1x128x128xbf16> to vector<128x128xbf16>
      %cst_26 = arith.constant dense<0.000000e+00> : vector<128x128xf32>
      %47 = tpu.matmul %44, %46, %cst_26 {dimension_numbers = #tpu.dot_dimension_numbers<[1], [0], [0], [1], [0, 0, 1, 1], [], []>} : vector<128x128xbf16>, vector<128x128xbf16>, vector<128x128xf32> -> vector<128x128xf32>
      %c0_27 = arith.constant 0 : index
      %c0_28 = arith.constant 0 : index
      %c0_29 = arith.constant 0 : index
      %48 = vector.load %arg5[%c0_27, %c0_28, %c0_29] : memref<1x128x128xbf16, #tpu.memory_space<vmem>>, vector<1x128x128xbf16>
      %49 = vector.shape_cast %48 : vector<1x128x128xbf16> to vector<128x128xbf16>
      %cst_30 = arith.constant dense<0.000000e+00> : vector<128x128xf32>
      %50 = tpu.matmul %40, %49, %cst_30 {dimension_numbers = #tpu.dot_dimension_numbers<[1], [0], [0], [1], [0, 0, 1, 1], [], []>} : vector<128x128xbf16>, vector<128x128xbf16>, vector<128x128xf32> -> vector<128x128xf32>
      %51 = arith.addf %47, %50 : vector<128x128xf32>
      %c0_31 = arith.constant 0 : index
      %c0_32 = arith.constant 0 : index
      %c0_33 = arith.constant 0 : index
      %52 = vector.load %arg6[%c0_31, %c0_32, %c0_33] : memref<1x1x128xf32, #tpu.memory_space<vmem>>, vector<1x1x128xf32>
      %53 = vector.shape_cast %52 : vector<1x1x128xf32> to vector<1x128xf32>
      %54 = vector.broadcast %53 : vector<1x128xf32> to vector<128x128xf32>
      %55 = arith.addf %51, %54 : vector<128x128xf32>
      %cst_34 = arith.constant 0.000000e+00 : f32
      %56 = vector.broadcast %cst_34 : f32 to vector<128x128xf32>
      %57 = arith.maximumf %55, %56 : vector<128x128xf32>
      %58 = tpu.iota {dimensions = array<i32: 0>} : vector<128x128xi32>
      %59 = vector.broadcast %1 : i32 to vector<128x128xi32>
      %60 = arith.addi %59, %58 : vector<128x128xi32>
      %c200_i32 = arith.constant 200 : i32
      %61 = vector.broadcast %c200_i32 : i32 to vector<128x128xi32>
      %62 = arith.cmpi slt, %60, %61 : vector<128x128xi32>
      %cst_35 = arith.constant 0.000000e+00 : f32
      %63 = vector.broadcast %cst_35 : f32 to vector<128x128xf32>
      %64 = arith.select %62, %57, %63 : vector<128x128xi1>, vector<128x128xf32>
      %c2_i32_36 = arith.constant 2 : i32
      %65 = arith.cmpi slt, %arg0, %c2_i32_36 : i32
      %66 = arith.extui %65 : i1 to i32
      %c0_i32_37 = arith.constant 0 : i32
      %67 = arith.cmpi ne, %66, %c0_i32_37 : i32
      scf.if %67 {
        %71 = arith.truncf %64 : vector<128x128xf32> to vector<128x128xbf16>
        %c0_40 = arith.constant 0 : index
        %72 = arith.index_cast %1 : i32 to index
        %c0_41 = arith.constant 0 : index
        %73 = vector.load %arg9[%c0_40, %72, %c0_41] : memref<2x256x128xbf16, #tpu.memory_space<vmem>>, vector<1x128x128xbf16>
        %74 = vector.shape_cast %73 : vector<1x128x128xbf16> to vector<128x128xbf16>
        %75 = vector.shape_cast %71 : vector<128x128xbf16> to vector<1x128x128xbf16>
        tpu.vector_store %arg9[%c0_40, %72, %c0_41], %75 {strides = array<i32>} : memref<2x256x128xbf16, #tpu.memory_space<vmem>>, vector<1x128x128xbf16>,
      } else {
      }
      %c2_i32_38 = arith.constant 2 : i32
      %68 = arith.cmpi eq, %arg0, %c2_i32_38 : i32
      %69 = arith.extui %68 : i1 to i32
      %c0_i32_39 = arith.constant 0 : i32
      %70 = arith.cmpi ne, %69, %c0_i32_39 : i32
      scf.if %70 {
        %71 = arith.index_cast %1 : i32 to index
        %c0_40 = arith.constant 0 : index
        %72 = vector.load %arg8[%71, %c0_40] : memref<256x128xf32, #tpu.memory_space<vmem>>, vector<128x128xf32>
        tpu.vector_store %arg8[%71, %c0_40], %64 {strides = array<i32>} : memref<256x128xf32, #tpu.memory_space<vmem>>, vector<128x128xf32>,
      } else {
      }
    } else {
    }
    %c0_i32_4 = arith.constant 0 : i32
    %8 = arith.cmpi sgt, %arg0, %c0_i32_4 : i32
    %c2_i32 = arith.constant 2 : i32
    %c0_i32_5 = arith.constant 0 : i32
    %9 = arith.cmpi eq, %c2_i32, %c0_i32_5 : i32
    %c1_i32 = arith.constant 1 : i32
    %10 = arith.select %9, %c1_i32, %c2_i32 : i32
    %11 = arith.remsi %arg0, %10 : i32
    %c0_i32_6 = arith.constant 0 : i32
    %12 = arith.cmpi ne, %11, %c0_i32_6 : i32
    %c0_i32_7 = arith.constant 0 : i32
    %13 = arith.cmpi slt, %11, %c0_i32_7 : i32
    %c0_i32_8 = arith.constant 0 : i32
    %14 = arith.cmpi slt, %10, %c0_i32_8 : i32
    %15 = arith.xori %13, %14 : i1
    %16 = arith.andi %15, %12 : i1
    %17 = arith.addi %11, %10 : i32
    %18 = arith.select %16, %17, %11 : i32
    %c1_i32_9 = arith.constant 1 : i32
    %19 = arith.cmpi eq, %18, %c1_i32_9 : i32
    %20 = arith.andi %8, %19 : i1
    %21 = arith.extui %20 : i1 to i32
    %c0_i32_10 = arith.constant 0 : i32
    %22 = arith.cmpi ne, %21, %c0_i32_10 : i32
    scf.if %22 {
      %c0_20 = arith.constant 0 : index
      %c0_21 = arith.constant 0 : index
      %c0_22 = arith.constant 0 : index
      %38 = vector.load %arg9[%c0_20, %c0_21, %c0_22] : memref<2x256x128xbf16, #tpu.memory_space<vmem>>, vector<1x256x128xbf16>
      %39 = vector.shape_cast %38 : vector<1x256x128xbf16> to vector<256x128xbf16>
      %c0_23 = arith.constant 0 : index
      %40 = arith.index_cast %1 : i32 to index
      %c0_24 = arith.constant 0 : index
      %41 = vector.load %arg9[%c0_23, %40, %c0_24] : memref<2x256x128xbf16, #tpu.memory_space<vmem>>, vector<1x128x128xbf16>
      %42 = vector.shape_cast %41 : vector<1x128x128xbf16> to vector<128x128xbf16>
      %cst = arith.constant dense<0.000000e+00> : vector<128x128xf32>
      %43 = tpu.matmul %3, %39, %cst {dimension_numbers = #tpu.dot_dimension_numbers<[1], [0], [0], [1], [0, 0, 1, 1], [], []>} : vector<128x256xbf16>, vector<256x128xbf16>, vector<128x128xf32> -> vector<128x128xf32>
      %44 = vector.broadcast %4 : vector<128x1xf32> to vector<128x128xf32>
      %45 = arith.mulf %43, %44 : vector<128x128xf32>
      %46 = arith.truncf %45 : vector<128x128xf32> to vector<128x128xbf16>
      %c0_25 = arith.constant 0 : index
      %c0_26 = arith.constant 0 : index
      %c0_27 = arith.constant 0 : index
      %47 = vector.load %arg4[%c0_25, %c0_26, %c0_27] : memref<1x128x128xbf16, #tpu.memory_space<vmem>>, vector<1x128x128xbf16>
      %48 = vector.shape_cast %47 : vector<1x128x128xbf16> to vector<128x128xbf16>
      %cst_28 = arith.constant dense<0.000000e+00> : vector<128x128xf32>
      %49 = tpu.matmul %46, %48, %cst_28 {dimension_numbers = #tpu.dot_dimension_numbers<[1], [0], [0], [1], [0, 0, 1, 1], [], []>} : vector<128x128xbf16>, vector<128x128xbf16>, vector<128x128xf32> -> vector<128x128xf32>
      %c0_29 = arith.constant 0 : index
      %c0_30 = arith.constant 0 : index
      %c0_31 = arith.constant 0 : index
      %50 = vector.load %arg5[%c0_29, %c0_30, %c0_31] : memref<1x128x128xbf16, #tpu.memory_space<vmem>>, vector<1x128x128xbf16>
      %51 = vector.shape_cast %50 : vector<1x128x128xbf16> to vector<128x128xbf16>
      %cst_32 = arith.constant dense<0.000000e+00> : vector<128x128xf32>
      %52 = tpu.matmul %42, %51, %cst_32 {dimension_numbers = #tpu.dot_dimension_numbers<[1], [0], [0], [1], [0, 0, 1, 1], [], []>} : vector<128x128xbf16>, vector<128x128xbf16>, vector<128x128xf32> -> vector<128x128xf32>
      %53 = arith.addf %49, %52 : vector<128x128xf32>
      %c0_33 = arith.constant 0 : index
      %c0_34 = arith.constant 0 : index
      %c0_35 = arith.constant 0 : index
      %54 = vector.load %arg6[%c0_33, %c0_34, %c0_35] : memref<1x1x128xf32, #tpu.memory_space<vmem>>, vector<1x1x128xf32>
      %55 = vector.shape_cast %54 : vector<1x1x128xf32> to vector<1x128xf32>
      %56 = vector.broadcast %55 : vector<1x128xf32> to vector<128x128xf32>
      %57 = arith.addf %53, %56 : vector<128x128xf32>
      %cst_36 = arith.constant 0.000000e+00 : f32
      %58 = vector.broadcast %cst_36 : f32 to vector<128x128xf32>
      %59 = arith.maximumf %57, %58 : vector<128x128xf32>
      %60 = tpu.iota {dimensions = array<i32: 0>} : vector<128x128xi32>
      %61 = vector.broadcast %1 : i32 to vector<128x128xi32>
      %62 = arith.addi %61, %60 : vector<128x128xi32>
      %c200_i32 = arith.constant 200 : i32
      %63 = vector.broadcast %c200_i32 : i32 to vector<128x128xi32>
      %64 = arith.cmpi slt, %62, %63 : vector<128x128xi32>
      %cst_37 = arith.constant 0.000000e+00 : f32
      %65 = vector.broadcast %cst_37 : f32 to vector<128x128xf32>
      %66 = arith.select %64, %59, %65 : vector<128x128xi1>, vector<128x128xf32>
      %c2_i32_38 = arith.constant 2 : i32
      %67 = arith.cmpi slt, %arg0, %c2_i32_38 : i32
      %68 = arith.extui %67 : i1 to i32
      %c0_i32_39 = arith.constant 0 : i32
      %69 = arith.cmpi ne, %68, %c0_i32_39 : i32
      scf.if %69 {
        %73 = arith.truncf %66 : vector<128x128xf32> to vector<128x128xbf16>
        %c1 = arith.constant 1 : index
        %74 = arith.index_cast %1 : i32 to index
        %c0_42 = arith.constant 0 : index
        %75 = vector.load %arg9[%c1, %74, %c0_42] : memref<2x256x128xbf16, #tpu.memory_space<vmem>>, vector<1x128x128xbf16>
        %76 = vector.shape_cast %75 : vector<1x128x128xbf16> to vector<128x128xbf16>
        %77 = vector.shape_cast %73 : vector<128x128xbf16> to vector<1x128x128xbf16>
        tpu.vector_store %arg9[%c1, %74, %c0_42], %77 {strides = array<i32>} : memref<2x256x128xbf16, #tpu.memory_space<vmem>>, vector<1x128x128xbf16>,
      } else {
      }
      %c2_i32_40 = arith.constant 2 : i32
      %70 = arith.cmpi eq, %arg0, %c2_i32_40 : i32
      %71 = arith.extui %70 : i1 to i32
      %c0_i32_41 = arith.constant 0 : i32
      %72 = arith.cmpi ne, %71, %c0_i32_41 : i32
      scf.if %72 {
        %73 = arith.index_cast %1 : i32 to index
        %c0_42 = arith.constant 0 : index
        %74 = vector.load %arg8[%73, %c0_42] : memref<256x128xf32, #tpu.memory_space<vmem>>, vector<128x128xf32>
        tpu.vector_store %arg8[%73, %c0_42], %66 {strides = array<i32>} : memref<256x128xf32, #tpu.memory_space<vmem>>, vector<128x128xf32>,
      } else {
      }
    } else {
    }
    %c0_i32_11 = arith.constant 0 : i32
    %23 = arith.cmpi sgt, %arg0, %c0_i32_11 : i32
    %c2_i32_12 = arith.constant 2 : i32
    %c0_i32_13 = arith.constant 0 : i32
    %24 = arith.cmpi eq, %c2_i32_12, %c0_i32_13 : i32
    %c1_i32_14 = arith.constant 1 : i32
    %25 = arith.select %24, %c1_i32_14, %c2_i32_12 : i32
    %26 = arith.remsi %arg0, %25 : i32
    %c0_i32_15 = arith.constant 0 : i32
    %27 = arith.cmpi ne, %26, %c0_i32_15 : i32
    %c0_i32_16 = arith.constant 0 : i32
    %28 = arith.cmpi slt, %26, %c0_i32_16 : i32
    %c0_i32_17 = arith.constant 0 : i32
    %29 = arith.cmpi slt, %25, %c0_i32_17 : i32
    %30 = arith.xori %28, %29 : i1
    %31 = arith.andi %30, %27 : i1
    %32 = arith.addi %26, %25 : i32
    %33 = arith.select %31, %32, %26 : i32
    %c0_i32_18 = arith.constant 0 : i32
    %34 = arith.cmpi eq, %33, %c0_i32_18 : i32
    %35 = arith.andi %23, %34 : i1
    %36 = arith.extui %35 : i1 to i32
    %c0_i32_19 = arith.constant 0 : i32
    %37 = arith.cmpi ne, %36, %c0_i32_19 : i32
    scf.if %37 {
      %c1 = arith.constant 1 : index
      %c0_20 = arith.constant 0 : index
      %c0_21 = arith.constant 0 : index
      %38 = vector.load %arg9[%c1, %c0_20, %c0_21] : memref<2x256x128xbf16, #tpu.memory_space<vmem>>, vector<1x256x128xbf16>
      %39 = vector.shape_cast %38 : vector<1x256x128xbf16> to vector<256x128xbf16>
      %c1_22 = arith.constant 1 : index
      %40 = arith.index_cast %1 : i32 to index
      %c0_23 = arith.constant 0 : index
      %41 = vector.load %arg9[%c1_22, %40, %c0_23] : memref<2x256x128xbf16, #tpu.memory_space<vmem>>, vector<1x128x128xbf16>
      %42 = vector.shape_cast %41 : vector<1x128x128xbf16> to vector<128x128xbf16>
      %cst = arith.constant dense<0.000000e+00> : vector<128x128xf32>
      %43 = tpu.matmul %3, %39, %cst {dimension_numbers = #tpu.dot_dimension_numbers<[1], [0], [0], [1], [0, 0, 1, 1], [], []>} : vector<128x256xbf16>, vector<256x128xbf16>, vector<128x128xf32> -> vector<128x128xf32>
      %44 = vector.broadcast %4 : vector<128x1xf32> to vector<128x128xf32>
      %45 = arith.mulf %43, %44 : vector<128x128xf32>
      %46 = arith.truncf %45 : vector<128x128xf32> to vector<128x128xbf16>
      %c0_24 = arith.constant 0 : index
      %c0_25 = arith.constant 0 : index
      %c0_26 = arith.constant 0 : index
      %47 = vector.load %arg4[%c0_24, %c0_25, %c0_26] : memref<1x128x128xbf16, #tpu.memory_space<vmem>>, vector<1x128x128xbf16>
      %48 = vector.shape_cast %47 : vector<1x128x128xbf16> to vector<128x128xbf16>
      %cst_27 = arith.constant dense<0.000000e+00> : vector<128x128xf32>
      %49 = tpu.matmul %46, %48, %cst_27 {dimension_numbers = #tpu.dot_dimension_numbers<[1], [0], [0], [1], [0, 0, 1, 1], [], []>} : vector<128x128xbf16>, vector<128x128xbf16>, vector<128x128xf32> -> vector<128x128xf32>
      %c0_28 = arith.constant 0 : index
      %c0_29 = arith.constant 0 : index
      %c0_30 = arith.constant 0 : index
      %50 = vector.load %arg5[%c0_28, %c0_29, %c0_30] : memref<1x128x128xbf16, #tpu.memory_space<vmem>>, vector<1x128x128xbf16>
      %51 = vector.shape_cast %50 : vector<1x128x128xbf16> to vector<128x128xbf16>
      %cst_31 = arith.constant dense<0.000000e+00> : vector<128x128xf32>
      %52 = tpu.matmul %42, %51, %cst_31 {dimension_numbers = #tpu.dot_dimension_numbers<[1], [0], [0], [1], [0, 0, 1, 1], [], []>} : vector<128x128xbf16>, vector<128x128xbf16>, vector<128x128xf32> -> vector<128x128xf32>
      %53 = arith.addf %49, %52 : vector<128x128xf32>
      %c0_32 = arith.constant 0 : index
      %c0_33 = arith.constant 0 : index
      %c0_34 = arith.constant 0 : index
      %54 = vector.load %arg6[%c0_32, %c0_33, %c0_34] : memref<1x1x128xf32, #tpu.memory_space<vmem>>, vector<1x1x128xf32>
      %55 = vector.shape_cast %54 : vector<1x1x128xf32> to vector<1x128xf32>
      %56 = vector.broadcast %55 : vector<1x128xf32> to vector<128x128xf32>
      %57 = arith.addf %53, %56 : vector<128x128xf32>
      %cst_35 = arith.constant 0.000000e+00 : f32
      %58 = vector.broadcast %cst_35 : f32 to vector<128x128xf32>
      %59 = arith.maximumf %57, %58 : vector<128x128xf32>
      %60 = tpu.iota {dimensions = array<i32: 0>} : vector<128x128xi32>
      %61 = vector.broadcast %1 : i32 to vector<128x128xi32>
      %62 = arith.addi %61, %60 : vector<128x128xi32>
      %c200_i32 = arith.constant 200 : i32
      %63 = vector.broadcast %c200_i32 : i32 to vector<128x128xi32>
      %64 = arith.cmpi slt, %62, %63 : vector<128x128xi32>
      %cst_36 = arith.constant 0.000000e+00 : f32
      %65 = vector.broadcast %cst_36 : f32 to vector<128x128xf32>
      %66 = arith.select %64, %59, %65 : vector<128x128xi1>, vector<128x128xf32>
      %c2_i32_37 = arith.constant 2 : i32
      %67 = arith.cmpi slt, %arg0, %c2_i32_37 : i32
      %68 = arith.extui %67 : i1 to i32
      %c0_i32_38 = arith.constant 0 : i32
      %69 = arith.cmpi ne, %68, %c0_i32_38 : i32
      scf.if %69 {
        %73 = arith.truncf %66 : vector<128x128xf32> to vector<128x128xbf16>
        %c0_41 = arith.constant 0 : index
        %74 = arith.index_cast %1 : i32 to index
        %c0_42 = arith.constant 0 : index
        %75 = vector.load %arg9[%c0_41, %74, %c0_42] : memref<2x256x128xbf16, #tpu.memory_space<vmem>>, vector<1x128x128xbf16>
        %76 = vector.shape_cast %75 : vector<1x128x128xbf16> to vector<128x128xbf16>
        %77 = vector.shape_cast %73 : vector<128x128xbf16> to vector<1x128x128xbf16>
        tpu.vector_store %arg9[%c0_41, %74, %c0_42], %77 {strides = array<i32>} : memref<2x256x128xbf16, #tpu.memory_space<vmem>>, vector<1x128x128xbf16>,
      } else {
      }
      %c2_i32_39 = arith.constant 2 : i32
      %70 = arith.cmpi eq, %arg0, %c2_i32_39 : i32
      %71 = arith.extui %70 : i1 to i32
      %c0_i32_40 = arith.constant 0 : i32
      %72 = arith.cmpi ne, %71, %c0_i32_40 : i32
      scf.if %72 {
        %73 = arith.index_cast %1 : i32 to index
        %c0_41 = arith.constant 0 : index
        %74 = vector.load %arg8[%73, %c0_41] : memref<256x128xf32, #tpu.memory_space<vmem>>, vector<128x128xf32>
        tpu.vector_store %arg8[%73, %c0_41], %66 {strides = array<i32>} : memref<256x128xf32, #tpu.memory_space<vmem>>, vector<128x128xf32>,
      } else {
      }
    } else {
    }
    return
  }
  func.func @transform_0(%arg0: i32, %arg1: i32) -> (i32, i32) {
    %c0_i32 = arith.constant 0 : i32
    %c0_i32_0 = arith.constant 0 : i32
    return %arg1, %c0_i32 : i32, i32
  }
  func.func @transform_1(%arg0: i32, %arg1: i32) -> (i32, i32) {
    %c0_i32 = arith.constant 0 : i32
    %c0_i32_0 = arith.constant 0 : i32
    %c0_i32_1 = arith.constant 0 : i32
    return %c0_i32, %c0_i32_0 : i32, i32
  }
  func.func @transform_2(%arg0: i32, %arg1: i32) -> (i32, i32, i32) {
    %c0_i32 = arith.constant 0 : i32
    %c0_i32_0 = arith.constant 0 : i32
    %c0_i32_1 = arith.constant 0 : i32
    return %arg0, %c0_i32, %c0_i32_0 : i32, i32, i32
  }
  func.func @transform_3(%arg0: i32, %arg1: i32) -> (i32, i32, i32) {
    %c0_i32 = arith.constant 0 : i32
    %c0_i32_0 = arith.constant 0 : i32
    %c0_i32_1 = arith.constant 0 : i32
    return %arg0, %c0_i32, %c0_i32_0 : i32, i32, i32
  }
  func.func @transform_4(%arg0: i32, %arg1: i32) -> (i32, i32, i32) {
    %c0_i32 = arith.constant 0 : i32
    %c0_i32_0 = arith.constant 0 : i32
    %c0_i32_1 = arith.constant 0 : i32
    return %arg0, %c0_i32, %c0_i32_0 : i32, i32, i32
  }
  func.func @transform_5(%arg0: i32, %arg1: i32) -> (i32, i32) {
    %c0_i32 = arith.constant 0 : i32
    %c0_i32_0 = arith.constant 0 : i32
    return %arg1, %c0_i32 : i32, i32
  }
  func.func @transform_6(%arg0: i32, %arg1: i32) -> (i32, i32) {
    %c0_i32 = arith.constant 0 : i32
    %c0_i32_0 = arith.constant 0 : i32
    %c0_i32_1 = arith.constant 0 : i32
    return %c0_i32, %c0_i32_0 : i32, i32
  }
}

</mosaic_0001>

<bundles_post_ra>
// kernel: _sage_gcn_forward.1
= control target key start
LH: loop header
LB: loop body
LE: loop exit
PB: predicated region body
PF: predicated region fallthrough
CT: control target
= control target key end

     0   :  { %s4926_s0 = inlined_call_operand.hbm [shape: s8[256,256], index: 0, kind: input, shape index: {}]   ;;  %s4927_s1 = inlined_call_operand.hbm [shape: bf16[256,128], index: 1, kind: input, shape index: {}]   ;;  %s4928_s2 = inlined_call_operand.vmem [shape: bf16[3,128,128], index: 2, kind: input, shape index: {}]   ;;  %s4929_s3 = inlined_call_operand.hbm [shape: bf16[3,128,128], index: 3, kind: input, shape index: {}]   ;;  %s4930_s4 = inlined_call_operand.vmem [shape: f32[3,1,128], index: 4, kind: input, shape index: {}]   ;;  %s4931_s5 = inlined_call_operand.vmem [shape: f32[256,1], index: 5, kind: input, shape index: {}]   ;;  %s4932_s6 = inlined_call_operand.hbm [shape: f32[256,128], index: 6, kind: output, shape index: {}]  }
   0x1   :  { %4945 = sst [smem:[#allocation19_spill]] %s4926_s0 }
   0x2   :  { %4946 = sst [smem:[#allocation20_spill]] %s4932_s6 }
   0x3   :  { %11 = vsyncpa [#allocation4], 0 }
   0x4   :  { %13 = vsyncpa [#allocation4 + $0x1], 0 }
   0x5   :  { %14 = vsyncpa [#allocation7], 0 }
   0x6   :  { %15 = vsyncpa [#allocation5], 0  ;;  %s4007_s21 = smov 0   ;;  %s4009_s22 = smov 0  }
   0x7   :  { %s4011_s23 = smov 0   ;;  %s4013_s24 = smov 0  }
   0x8   :  { %s4015_s25 = smov 0   ;;  %s4017_s26 = smov 0  }
   0x9   :  { %s4019_s27 = smov 0   ;;  %s4021_s28 = smov 0  }
   0xa   :  { %s4023_s29 = smov 0   ;;  %s4025_s30 = smov 0  }
   0xb   :  { %s4027_s7 = smov 0  }
   0xc LB: > { %4947 = sst [smem:[#allocation14_spill]] %s3937_s26  ;;  %s30_s8 = sadd.s32 1, %s3949_s29  ;;  %s3957_s7 = sphi %s4027_s7, %s21_s7   ;;  %s3953_s30 = sphi %s4025_s30, %s4982_s30   ;;  %s3949_s29 = sphi %s4023_s29, %s4975_s29   ;;  %s3945_s28 = sphi %s4021_s28, %s4981_s28   ;;  %s3941_s27 = sphi %s4019_s27, %s4974_s27   ;;  %s3937_s26 = sphi %s4017_s26, %s4973_s26   ;;  %s3933_s25 = sphi %s4015_s25, %s4980_s25   ;;  %s3929_s24 = sphi %s4013_s24, %s4979_s24   ;;  %s3925_s23 = sphi %s4011_s23, %s4978_s23   ;;  %s3921_s22 = sphi %s4009_s22, %s4977_s22   ;;  %s3917_s21 = sphi %s4007_s21, %s4976_s21  }
   0xd   : > { %4948 = sst [smem:[#allocation15_spill]] %s3949_s29  ;;  %s40_s9 = sadd.s32 1, %s3937_s26 }
   0xe   : > { %p4064_p0 = scmp.ge.s32.totalorder %s30_s8, 2  ;;  %p47_p1 = scmp.ne.s32.totalorder %s3937_s26, %s3933_s25 }
   0xf   : > { %p4936_p2 = scmp.eq.s32.totalorder %s3957_s7, 0  ;;  %p4935_p4 = scmp.lt.s32.totalorder %s3957_s7, 6 }
  0x10   : > { %s4949_s10 = scalar_select %p4064_p0, 1, 0 }
  0x11   : > { %s4984_s8 = smov (%p4064_p0, %s30_s8), 0  ;;  %p49_p3 = por %p4936_p2, %p47_p1 }
  0x12   : > { %4950 = sst [smem:[#allocation16_spill]] %s4984_s8  ;;  %s37_s11 = ssub.s32 %s3949_s29, %s4984_s8 }
  0x13   : > { %s236_s12 = sand.u32 1, %s3957_s7   ;;  %p38_p5 = scmp.eq.s32.totalorder %s37_s11, 0 }
  0x14   : > { %s238_s13 = sand.u32 1, %s3937_s26   ;;  %s3005_s14 = sshll.u32 %s3949_s29, 10 }
  0x15   : > { %s4084_s15 = scalar_select %p38_p5, %s3937_s26, %s40_s9  }
  0x16   : > { %s2877_s16 = sshll.u32 %s238_s13, 6  ;;  %s4952_s0 = sld [smem:[#allocation19_spill]] }
  0x17   : > { %4951 = sst [smem:[#allocation17_spill]] %s4084_s15  ;;  %p4093_p6 = pnand %p4935_p4, %p49_p3 }
  0x18   : > { %s240_s11 = scalar_lea.vmem [#allocation3], %s2877_s16  ;;  %s4099_s13 = scalar_lea.sflag [#allocation4], %s236_s12 }
  0x19   : > { %s248_s9 = sshll.u32 %s240_s11, 4  ;;  %p3743_p8 = pneg %p4093_p6  ;;  %s4097_s9 = int_to_ptr.vmem [resolvable:$true] %s248_s9 }
  0x1c   : > { %s4089_s19 = scalar_lea.hbm %s4952_s0, %s3005_s14  ;;  %s3746_s8 = scalar_lea.hbm %s4952_s0, 2048 }
  0x1d   : > { %s3741_s17 = scalar_lea.hbm %s4089_s19, 1024  ;;  %p3747_p11 = scmp.lt.u32.totalorder %s4089_s19, %s4952_s0 }
  0x1e   : > { %p3742_p7 = scmp.ne.s32.totalorder %s4089_s19, %s3741_s17  ;;  %p3748_p12 = scmp.lt.u32.totalorder %s3746_s8, %s3741_s17 }
  0x1f   : > { %p3750_p1 = scmp.lt.u32.totalorder %s3741_s17, %s4089_s19 }
  0x20   : > { %p3744_p9 = pnand %p3743_p8, %p3742_p7  ;;  %p3749_p13 = por %p3748_p12, %p3747_p11 }
  0x22   : > { %p3745_p10 = pneg %p3744_p9  ;;  %p3751_p3 = por %p3750_p1, %p3749_p13 }
  0x24   : > { %p3752_p5 = pnand %p3751_p3, %p3745_p10 }
  0x26   : > { %3755 = shalt.err (!%p3752_p5)
}
  0x27   : > { %s3756_s12 = scalar_lea.vmem %s4097_s9, 1024  ;;  %s3959_s16 = smov [#allocation3]  }
  0x28   : > { %p3757_p7 = scmp.ne.s32.totalorder %s4097_s9, %s3756_s12  ;;  %s3761_s11 = sshll.u32 %s3959_s16, 4  ;;  %s3762_s11 = int_to_ptr.vmem [resolvable:$false] %s3761_s11 }
  0x29   : > { %s3763_s29 = scalar_lea.vmem %s3762_s11, 2048  ;;  %p3764_p2 = scmp.lt.s32.totalorder %s4097_s9, %s3762_s11 }
  0x2a   : > { %p3759_p9 = pnand %p3757_p7, %p3743_p8  ;;  %p3765_p11 = scmp.lt.s32.totalorder %s3763_s29, %s3756_s12 }
  0x2c   : > { %p3760_p4 = pneg %p3759_p9  ;;  %p3766_p12 = por %p3765_p11, %p3764_p2 }
  0x2e   : > { %p3767_p13 = pnand %p3766_p12, %p3760_p4 }
  0x30   : > { %3770 = shalt.err (!%p3767_p13)
}
  0x31   : > { %s3960_s8 = smov 256   ;;  %s3961_s15 = smov 16  }
  0x32   : > { %3555 = dma.hbm_to_vmem [thread:$0]  (!%p4093_p6), %s4089_s19, 1024, %s4097_s9, %s4099_s13, %s3960_s8, %s3960_s8, %s3961_s15  }
  0x33   : > { %s4128_s17 = sadd.s32 4294967295, %s3957_s7   ;;  %p53_p2 = scmp.ne.s32.totalorder %s3933_s25, %s3929_s24 }
  0x34   : > { %p4937_p4 = scmp.eq.s32.totalorder %s4128_s17, 0  ;;  %p126_p8 = scmp.ne.s32.totalorder %s3921_s22, %s3917_s21 }
  0x35   : > { %p2874_p10 = scmp.ge.s32.totalorder %s3957_s7, 1  ;;  %p210_p3 = scmp.lt.s32.totalorder %s3957_s7, 7 }
  0x36   : > { %p4138_p1 = por %p4937_p4, %p53_p2  ;;  %p4145_p5 = por %p126_p8, %p4937_p4 }
  0x37   : > { %p4149_p6 = pnand %p2874_p10, %p210_p3  ;;  %s3962_s24 = smov [#allocation6]  }
  0x38   : > { %s4954_s14 = scalar_select %p4138_p1, 1, 0 }
  0x39   : > { %s4955_s20 = scalar_select %p4145_p5, 1, 0 }
  0x3a   : > { %s4956_s19 = scalar_select %p4149_p6, 1, 0 }
  0x3b   : > { %s222_s9 = sshll.u32 %s3962_s24, 4  ;;  %p3548_p7 = pneg %p4149_p6  ;;  %s223_s9 = int_to_ptr.vmem [resolvable:$true] %s222_s9 }
  0x3c   : > { %s33_s18 = sadd.s32 1, %s3953_s30  ;;  %s3771_s11 = scalar_lea.hbm %s4927_s1, 2048 }
  0x3d   : > { %p4157_p9 = pnand %p3548_p7, %p4937_p4  ;;  %p3772_p11 = scmp.ne.s32.totalorder %s4927_s1, %s3771_s11 }
  0x3e   : > { %p3778_p8 = scmp.lt.u32.totalorder %s3771_s11, %s4927_s1 }
  0x3f   : > { %p3773_p12 = pneg %p4157_p9 }
  0x41   : > { %p3774_p13 = pnand %p3773_p12, %p3772_p11 }
  0x43   : > { %p3775_p2 = pneg %p3774_p13 }
  0x45   : > { %p3780_p10 = pnand %p3778_p8, %p3775_p2 }
  0x47   : > { %3783 = shalt.err (!%p3780_p10)
}
  0x48   : > { %s3784_s0 = scalar_lea.vmem %s223_s9, 2048  ;;  %p3792_p5 = scmp.lt.s32.totalorder %s223_s9, %s223_s9 }
  0x49   : > { %p3785_p3 = scmp.ne.s32.totalorder %s223_s9, %s3784_s0  ;;  %p3793_p1 = scmp.lt.s32.totalorder %s3784_s0, %s3784_s0 }
  0x4b   : > { %p3787_p7 = pnand %p3785_p3, %p3773_p12  ;;  %p3794_p6 = por %p3793_p1, %p3792_p5 }
  0x4d   : > { %p3788_p4 = pneg %p3787_p7 }
  0x4f   : > { %p3795_p0 = pnand %p3794_p6, %p3788_p4 }
  0x51   : > { %3798 = shalt.err (!%p3795_p0)
}
  0x52   : > { %s3963_s12 = smov 64   ;;  %s3964_s16 = smov 4  }
  0x53   : > { %3551 = dma.hbm_to_vmem [thread:$0]  (!%p4157_p9), %s4927_s1, 2048, %s223_s9, [#allocation7], %s3963_s12, %s3963_s12, %s3964_s16  }
  0x54   : > { %p4958_p0 = scmp.ne.s32.totalorder %s4949_s10, 0  ;;  %s113_s29 = sadd.s32 1, %s3925_s23 }
  0x55   : > { %p120_p4 = scmp.ne.s32.totalorder %s3925_s23, %s3921_s22  ;;  %s268_s8 = sand.u32 1, %s3925_s23  }
  0x56   : > { %s4986_s18 = smov (!%p4958_p0, %s33_s18), %s3953_s30  ;;  %p4959_p5 = scmp.eq.s32.totalorder %s3957_s7, 0 }
  0x57   : > { %p35_p1 = scmp.ge.s32.totalorder %s4986_s18, 3  ;;  %s2881_s15 = sshll.u32 %s268_s8, 6 }
  0x58   : > { %p122_p6 = por %p120_p4, %p4959_p5  ;;  %s3006_s21 = sshll.u32 %s3953_s30, 10 }
  0x59   : > { %s4988_s18 = smov (%p35_p1, %s4986_s18), 0  ;;  %s4198_s9 = scalar_lea.hbm %s4929_s3, %s3006_s21 }
  0x5a   : > { %s110_s24 = ssub.s32 %s3953_s30, %s4988_s18  ;;  %s270_s10 = scalar_lea.vmem [#allocation8], %s2881_s15 }
  0x5b   : > { %p111_p9 = scmp.eq.s32.totalorder %s110_s24, 0  ;;  %s277_s0 = sshll.u32 %s270_s10, 4  ;;  %s4200_s0 = int_to_ptr.vmem [resolvable:$true] %s277_s0 }
  0x5c   : > { %p4960_p11 = scmp.lt.s32.totalorder %s3957_s7, 6  ;;  %s3799_s6 = scalar_lea.hbm %s4198_s9, 1024 }
  0x5d   : > { %s4209_s8 = scalar_select %p111_p9, %s3925_s23, %s113_s29  }
  0x5e   : > { %p4204_p12 = pnand %p4960_p11, %p122_p6  ;;  %p3800_p13 = scmp.ne.s32.totalorder %s4198_s9, %s3799_s6 }
  0x5f   : > { %s3804_s21 = scalar_lea.hbm %s4929_s3, 3072  ;;  %p3805_p3 = scmp.lt.u32.totalorder %s4198_s9, %s4929_s3 }
  0x60   : > { %p3801_p2 = pneg %p4204_p12  ;;  %p3806_p7 = scmp.lt.u32.totalorder %s3804_s21, %s3799_s6 }
  0x61   : > { %p3808_p4 = scmp.lt.u32.totalorder %s3799_s6, %s4198_s9 }
  0x62   : > { %p3802_p8 = pnand %p3801_p2, %p3800_p13  ;;  %p3807_p0 = por %p3806_p7, %p3805_p3 }
  0x64   : > { %p3803_p10 = pneg %p3802_p8  ;;  %p3809_p1 = por %p3808_p4, %p3807_p0 }
  0x66   : > { %p3810_p5 = pnand %p3809_p1, %p3803_p10 }
  0x68   : > { %3813 = shalt.err (!%p3810_p5)
}
  0x69   : > { %s3814_s29 = scalar_lea.vmem %s4200_s0, 1024  ;;  %s3965_s26 = smov [#allocation8]  }
  0x6a   : > { %p3815_p6 = scmp.ne.s32.totalorder %s4200_s0, %s3814_s29  ;;  %s3819_s15 = sshll.u32 %s3965_s26, 4  ;;  %s3820_s15 = int_to_ptr.vmem [resolvable:$false] %s3819_s15 }
  0x6b   : > { %s3821_s24 = scalar_lea.vmem %s3820_s15, 2048  ;;  %p3822_p13 = scmp.lt.s32.totalorder %s4200_s0, %s3820_s15 }
  0x6c   : > { %p3817_p9 = pnand %p3815_p6, %p3801_p2  ;;  %p3823_p8 = scmp.lt.s32.totalorder %s3821_s24, %s3814_s29 }
  0x6e   : > { %p3818_p11 = pneg %p3817_p9  ;;  %p3824_p3 = por %p3823_p8, %p3822_p13 }
  0x70   : > { %p3825_p7 = pnand %p3824_p3, %p3818_p11 }
  0x72   : > { %3828 = shalt.err (!%p3825_p7)
}
  0x73   : > { %3558 = dma.hbm_to_vmem [thread:$0]  (!%p4204_p12), %s4198_s9, 1024, %s4200_s0, %s4099_s13, %s3963_s12, %s3963_s12, %s3964_s16  }
  0x74   : > { %p4962_p2 = scmp.ne.s32.totalorder %s4956_s19, 0 }
  0x76   : > { %304 = sbr.rel (%p4962_p2) target bundleno = 1817 (0x719), region = 44 }
  0x7d   : > { %s306_s6 = sand.u32 1, %s4128_s17   ;;  %s308_s21 = sand.u32 1, %s3933_s25  }
  0x7e   : > { %s2885_s10 = sshll.u32 %s308_s21, 6  ;;  %s307_s29 = scalar_lea.sflag [#allocation4], %s306_s6 }
  0x7f   : > { %s4244_s26 = scalar_lea.vmem [#allocation3], %s2885_s10  ;;  %p4963_p10 = scmp.ne.s32.totalorder %s4954_s14, 0 }
  0x81   : > { %3900 = dma.done.wait (%p4963_p10), %s307_s29, 1024  }
  0x82   : > { %3902 = vsyncadd (%p4963_p10), %s307_s29, 4294966272  ;;  %p4964_p0 = scmp.eq.s32.totalorder %s4128_s17, 0 }
  0x84   : > { %3904 = dma.done.wait (%p4964_p0), [#allocation7], 2048   ;;  %p4965_p12 = pmov %p4964_p0 }
  0x85   : > { %s321_s13 = sand.u32 1, %s3921_s22   ;;  %p4966_p4 = scmp.ne.s32.totalorder %s4955_s20, 0 }
  0x86   : > { %3906 = vsyncadd (%p4965_p12), [#allocation7], 4294965248  ;;  %s2887_s19 = sshll.u32 %s321_s13, 6 }
  0x87   : > { %s4255_s12 = scalar_lea.vmem [#allocation8], %s2887_s19 }
  0x88   : > { %3908 = dma.done.wait (%p4966_p4), %s307_s29, 1024  }
  0x89   : > { %3910 = vsyncadd (%p4966_p4), %s307_s29, 4294966272  ;;  %s2890_s14 = sshll.u32 %s3941_s27, 4  ;;  %p366_p1 = scmp.lt.s32.totalorder %s3945_s28, 2  ;;  %v382_v0 = vld [vmem:[%s4244_s26] sm:$0xff]  ;;  %v383_v1 = vld [vmem:[%s4244_s26 + $0x8] sm:$0xff] }
  0x8a   : > { %p375_p5 = scmp.lt.s32.totalorder %s2890_s14, 31  ;;  %s4264_s16 = sshll.u32 %s3941_s27, 7  ;;  %v384_v2 = vld [vmem:[%s4244_s26 + $0x10] sm:$0xff]  ;;  %v385_v3 = vld [vmem:[%s4244_s26 + $0x18] sm:$0xff]  ;;  %v386_v4 = vld [vmem:[%s4244_s26 + $0x20] sm:$0xff]  ;;  %v4288_v6 = vunpack.c.l.s8.bf16 %v382_v0  ;;  %v4290_v7 = vunpack.c.l.s8.bf16 %v383_v1  ;;  %v4292_v8 = vunpack.c.h.s8.bf16 %v382_v0  ;;  %v4294_v9 = vunpack.c.h.s8.bf16 %v383_v1 }
  0x8b   : > { %s367_s9 = scalar_select %p366_p1, %s3945_s28, 2  ;;  %v387_v5 = vld [vmem:[%s4244_s26 + $0x28] sm:$0xff]  ;;  %v388_v10 = vld [vmem:[%s4244_s26 + $0x30] sm:$0xff]  ;;  %v389_v11 = vld [vmem:[%s4244_s26 + $0x38] sm:$0xff]  ;;  %v4298_v12 = vunpack.c.l.s8.bf16 %v384_v2  ;;  %v4300_v13 = vunpack.c.l.s8.bf16 %v385_v3  ;;  %v4302_v14 = vunpack.c.h.s8.bf16 %v384_v2  ;;  %v4304_v15 = vunpack.c.h.s8.bf16 %v385_v3 }
  0x8c   : > { %s4990_s14 = smov (!%p375_p5, %s2890_s14), 31  ;;  %v4309_v17 = vunpack.c.l.s8.bf16 %v386_v4  ;;  %v4311_v18 = vunpack.c.l.s8.bf16 %v387_v5  ;;  %v4313_v19 = vunpack.c.h.s8.bf16 %v386_v4  ;;  %v4315_v20 = vunpack.c.h.s8.bf16 %v387_v5  ;;  %p2893_p6 = scmp.ne.s32.totalorder %s3945_s28, 0 }
  0x8d   : > { %s3007_s20 = sshll.u32 %s367_s9, 6  ;;  %s4270_s15 = scalar_lea.vmem %s4930_s4, %s367_s9  ;;  %v4326_v24 = vunpack.c.l.s8.bf16 %v388_v10  ;;  %v4328_v25 = vunpack.c.l.s8.bf16 %v389_v11  ;;  %v4330_v26 = vunpack.c.h.s8.bf16 %v388_v10  ;;  %v4332_v27 = vunpack.c.h.s8.bf16 %v389_v11  ;;  %v3665_v40 = vld [vmem:[#allocation6 + $0x40] sm:$0xff] (!%p2893_p6)   ;;  %606 = vmatprep.mubr.bf16.mxu0 (!%p2893_p6), %v4290_v7  ;;  %v3667_v43 = vld [vmem:[#allocation6 + $0x48] sm:$0xff] (!%p2893_p6)   ;;  %v3669_v45 = vld [vmem:[#allocation6 + $0x50] sm:$0xff] (!%p2893_p6)  }
  0x8e   : > { %s2891_s24 = sshll.u32 %s4990_s14, 3  ;;  %s4275_s10 = scalar_lea.vmem %s4928_s2, %s3007_s20  ;;  %v3666_v41 = vld [vmem:[#allocation6] sm:$0xff] (!%p2893_p6)   ;;  %v3966_v42 = vmov (!%p2893_p6), 0   ;;  %3008 = vmatprep.subr.bf16.mxu0 (!%p2893_p6), %v3665_v40  ;;  %v3668_v44 = vld [vmem:[#allocation6 + $0x8] sm:$0xff] (!%p2893_p6)   ;;  %v3670_v46 = vld [vmem:[#allocation6 + $0x10] sm:$0xff] (!%p2893_p6)  }
  0x8f   : > { %s4280_s27 = scalar_lea.vmem %s4931_s5, %s2891_s24  ;;  %4967 = vst [vmem:[#allocation18_spill] sm:$0xff] %v4330_v26  ;;  %425 = sbr.rel (%p2893_p6) target bundleno = 685 (0x2ad), region = 60  ;;  %3663 = vset.pattern.permute.xlu0 (!%p2893_p6), %v3966_v42  ;;  %3664 = vset.pattern.permute.xlu1 (!%p2893_p6), %v3966_v42  ;;  %v3671_v47 = vld [vmem:[#allocation6 + $0x58] sm:$0xff] (!%p2893_p6)   ;;  %v3673_v49 = vld [vmem:[#allocation6 + $0x60] sm:$0xff] (!%p2893_p6)   ;;  %v3675_v51 = vld [vmem:[#allocation6 + $0x68] sm:$0xff] (!%p2893_p6)  }
  0x90   : > { %v4307_v16 = vld [vmem:[%s4280_s27] sm:$0xff]  ;;  %v4318_v21 = vld [vmem:[%s4280_s27 + $0x8] sm:$0xff]  ;;  %v4321_v22 = vld [vmem:[%s4280_s27 + $0x10] sm:$0xff]  ;;  %3009 = vmatpush3.bf16.msra.mxu0 (!%p2893_p6), %v3666_v41  ;;  %s458_s26 = sshra.s32 (!%p2893_p6), %s4264_s16, 3  ;;  %p2936_p9 = scmp.ge.s32.totalorder (!%p2893_p6), %s3945_s28, 2 }
  0x91   : > { %v4324_v23 = vld [vmem:[%s4280_s27 + $0x18] sm:$0xff]  ;;  %v4335_v28 = vld [vmem:[%s4280_s27 + $0x20] sm:$0xff]  ;;  %v4338_v29 = vld [vmem:[%s4280_s27 + $0x28] sm:$0xff]  ;;  %673 = vperm.xlu0 (!%p2893_p6), %3663, %v4307_v16   ;;  %683 = vperm.xlu1 (!%p2893_p6), %3664, %v4321_v22   ;;  %s2894_s19 = sshll.u32 (!%p2893_p6), %s458_s26, 2 }
  0x92   : > { %v4341_v30 = vld [vmem:[%s4280_s27 + $0x30] sm:$0xff]  ;;  %v4344_v31 = vld [vmem:[%s4280_s27 + $0x38] sm:$0xff]  ;;  %v4347_v32 = vld [vmem:[%s4280_s27 + $0x40] sm:$0xff]  ;;  %3010 = vmatprep.subr.bf16.mxu0 (!%p2893_p6), %v3667_v43  ;;  %s4388_s14 = scalar_lea.vmem (!%p2893_p6), [#allocation6], %s2894_s19 }
  0x93   : > { %v4350_v33 = vld [vmem:[%s4280_s27 + $0x48] sm:$0xff]  ;;  %v4353_v34 = vld [vmem:[%s4280_s27 + $0x50] sm:$0xff]  ;;  %v4356_v35 = vld [vmem:[%s4280_s27 + $0x58] sm:$0xff] }
  0x94   : > { %v4359_v36 = vld [vmem:[%s4280_s27 + $0x60] sm:$0xff]  ;;  %v4362_v37 = vld [vmem:[%s4280_s27 + $0x68] sm:$0xff]  ;;  %v4365_v38 = vld [vmem:[%s4280_s27 + $0x70] sm:$0xff]  ;;  %3011 = vmatpush3.bf16.msra.mxu0 (!%p2893_p6), %v3668_v44 }
  0x95   : > { %v4368_v39 = vld [vmem:[%s4280_s27 + $0x78] sm:$0xff]  ;;  %678 = vperm.xlu0 (!%p2893_p6), %3663, %v4318_v21   ;;  %688 = vperm.xlu1 (!%p2893_p6), %3664, %v4324_v23   ;;  %v3674_v50 = vld [vmem:[#allocation6 + $0x20] sm:$0xff] (!%p2893_p6)   ;;  %v3682_v53 = vld [vmem:[%s4255_s12 + $0x8] sm:$0xff] (!%p2893_p6)  }
  0x96   : > { %3012 = vmatprep.subr.bf16.mxu0 %v3669_v45  ;;  %v3672_v48 = vld [vmem:[#allocation6 + $0x18] sm:$0xff]   ;;  %v3681_v52 = vld [vmem:[%s4255_s12] sm:$0xff]   ;;  %v3676_v54 = vld [vmem:[#allocation6 + $0x28] sm:$0xff]   ;;  %s1262_s9 = sshra.s32 (!%p2936_p9), %s4264_s16, 4 }
  0x97   : > { %3296 = vmatprep.subr.bf16.mxu1 %v3681_v52  ;;  %v3677_v55 = vld [vmem:[#allocation6 + $0x70] sm:$0xff]   ;;  %v3679_v58 = vld [vmem:[#allocation6 + $0x78] sm:$0xff]   ;;  %v3689_v59 = vld [vmem:[%s4388_s14] sm:$0xff]   ;;  %s2937_s20 = sshll.u32 (!%p2936_p9), %s1262_s9, 3 }
  0x98   : > { %3013 = vmatpush3.bf16.msra.mxu0 %v3670_v46  ;;  %3297 = vmatpush3.bf16.msra.mxu1 %v3681_v52  ;;  %v3683_v56 = vld [vmem:[%s4255_s12 + $0x10] sm:$0xff]   ;;  %v3684_v60 = vld [vmem:[%s4255_s12 + $0x18] sm:$0xff]   ;;  %v3685_v62 = vld [vmem:[%s4255_s12 + $0x20] sm:$0xff]   ;;  %s1265_s0 = scalar_lea.vmem (!%p2936_p9), [#allocation2], %s2937_s20 }
  0x99   : > { %693 = vperm.xlu0 %3663, %v4335_v28   ;;  %698 = vperm.xlu1 %3664, %v4338_v29   ;;  %v3678_v57 = vld [vmem:[#allocation6 + $0x30] sm:$0xff]   ;;  %v3680_v61 = vld [vmem:[#allocation6 + $0x38] sm:$0xff]   ;;  %v3686_v63 = vld [vmem:[%s4255_s12 + $0x28] sm:$0xff]  }
  0x9a   : > { %3014 = vmatprep.subr.bf16.mxu0 %v3671_v47  ;;  %3298 = vmatprep.subr.bf16.mxu1 %v3682_v53  ;;  %v3687_v0 = vld [vmem:[%s4255_s12 + $0x30] sm:$0xff]   ;;  %v3688_v1 = vld [vmem:[%s4255_s12 + $0x38] sm:$0xff]   ;;  %v3691_v2 = vld [vmem:[%s4275_s10] sm:$0xff]  }
  0x9b   : > { %3312 = vmatprep.mubr.bf16.mxu1 %v3689_v59  ;;  %v3690_v3 = vld [vmem:[%s4388_s14 + $0x8] sm:$0xff]   ;;  %v3693_v4 = vld [vmem:[%s4388_s14 + $0x10] sm:$0xff]   ;;  %v3694_v11 = vld [vmem:[%s4388_s14 + $0x18] sm:$0xff]  }
  0x9c   : > { %3015 = vmatpush3.bf16.msra.mxu0 %v3672_v48  ;;  %3299 = vmatpush3.bf16.msra.mxu1 %v3682_v53  ;;  %v3692_v5 = vld [vmem:[%s4275_s10 + $0x8] sm:$0xff]   ;;  %v3695_v10 = vld [vmem:[%s4275_s10 + $0x10] sm:$0xff]   ;;  %v3696_v40 = vld [vmem:[%s4275_s10 + $0x18] sm:$0xff]  }
  0x9d   : > { %703 = vperm.xlu0 %3663, %v4341_v30   ;;  %708 = vperm.xlu1 %3664, %v4344_v31   ;;  %v3697_v41 = vld [vmem:[%s4388_s14 + $0x20] sm:$0xff]   ;;  %v3698_v42 = vld [vmem:[%s4388_s14 + $0x28] sm:$0xff]   ;;  %v3701_v45 = vld [vmem:[%s4388_s14 + $0x30] sm:$0xff]  }
  0x9e   : > { %3016 = vmatprep.subr.bf16.mxu0 %v3673_v49  ;;  %3300 = vmatprep.subr.bf16.mxu1 %v3683_v56  ;;  %v3699_v43 = vld [vmem:[%s4275_s10 + $0x20] sm:$0xff]   ;;  %v3700_v44 = vld [vmem:[%s4275_s10 + $0x28] sm:$0xff]   ;;  %v3702_v46 = vld [vmem:[%s4388_s14 + $0x38] sm:$0xff]  }
  0x9f   : > { %v3703_v47 = vld [vmem:[%s4275_s10 + $0x30] sm:$0xff]   ;;  %v3704_v48 = vld [vmem:[%s4275_s10 + $0x38] sm:$0xff]  }
  0xa0   : > { %3017 = vmatpush3.bf16.msra.mxu0 %v3674_v50  ;;  %3301 = vmatpush3.bf16.msra.mxu1 %v3683_v56 }
  0xa1   : > { %713 = vperm.xlu0 %3663, %v4347_v32   ;;  %718 = vperm.xlu1 %3664, %v4350_v33  }
  0xa2   : > { %3018 = vmatprep.subr.bf16.mxu0 %v3675_v51  ;;  %3302 = vmatprep.subr.bf16.mxu1 %v3684_v60 }
  0xa4   : > { %3019 = vmatpush3.bf16.msra.mxu0 %v3676_v54  ;;  %3303 = vmatpush3.bf16.msra.mxu1 %v3684_v60 }
  0xa5   : > { %723 = vperm.xlu0 %3663, %v4353_v34   ;;  %728 = vperm.xlu1 %3664, %v4356_v35  }
  0xa6   : > { %3020 = vmatprep.subr.bf16.mxu0 %v3677_v55  ;;  %3304 = vmatprep.subr.bf16.mxu1 %v3685_v62 }
  0xa8   : > { %3021 = vmatpush3.bf16.msra.mxu0 %v3678_v57  ;;  %3305 = vmatpush3.bf16.msra.mxu1 %v3685_v62 }
  0xa9   : > { %733 = vperm.xlu0 %3663, %v4359_v36   ;;  %738 = vperm.xlu1 %3664, %v4362_v37  }
  0xaa   : > { %3022 = vmatprep.subr.bf16.mxu0 %v3679_v58  ;;  %3306 = vmatprep.subr.bf16.mxu1 %v3686_v63 }
  0xac   : > { %3023 = vmatpush3.bf16.msra.mxu0 %v3680_v61  ;;  %3307 = vmatpush3.bf16.msra.mxu1 %v3686_v63 }
  0xad   : > { %743 = vperm.xlu0 %3663, %v4365_v38   ;;  %748 = vperm.xlu1 %3664, %v4368_v39  }
  0xae   : > { %3308 = vmatprep.subr.bf16.mxu1 %v3687_v0 }
  0xaf   : > { %607 = vmatmul.mubr.bf16.vlgmr.msra.gmra.mrb[0].mxu0 %v4288_v6 }
  0xb0   : > { %614 = vmatprep.mubr.bf16.mxu0 %v4294_v9  ;;  %3309 = vmatpush3.bf16.msra.mxu1 %v3687_v0 }
  0xb1   : > { %3310 = vmatprep.subr.bf16.mxu1 %v3688_v1 }
  0xb4   : > { %3311 = vmatpush3.bf16.msra.mxu1 %v3688_v1 }
  0xb5   : > { %3328 = vmatprep.subr.bf16.mxu1 %v3691_v2 }
  0xb7   : > { %615 = vmatmul.mubr.bf16.gmra.mrb[4].mxu0 %v4292_v8  ;;  %3313 = vmatmul.mubr.bf16.vlgmr.msra.gmra.mrb[0].mxu1 %v3690_v3 }
  0xb8   : > { %622 = vmatprep.mubr.bf16.mxu0 %v4300_v13  ;;  %3329 = vmatpush3.bf16.msra.mxu1 %v3691_v2 }
  0xb9   : > { %3316 = vmatprep.mubr.bf16.mxu1 %v3693_v4  ;;  %3330 = vmatprep.subr.bf16.mxu1 %v3692_v5 }
  0xbc   : > { %3331 = vmatpush3.bf16.msra.mxu1 %v3692_v5 }
  0xbd   : > { %3332 = vmatprep.subr.bf16.mxu1 %v3695_v10 }
  0xbf   : > { %623 = vmatmul.mubr.bf16.gmra.mrb[8].mxu0 %v4298_v12  ;;  %3317 = vmatmul.mubr.bf16.gmra.mrb[4].mxu1 %v3694_v11 }
  0xc0   : > { %630 = vmatprep.mubr.bf16.mxu0 %v4304_v15  ;;  %3333 = vmatpush3.bf16.msra.mxu1 %v3695_v10 }
  0xc1   : > { %3334 = vmatprep.subr.bf16.mxu1 %v3696_v40  ;;  %3320 = vmatprep.mubr.bf16.mxu1 %v3697_v41 }
  0xc4   : > { %3335 = vmatpush3.bf16.msra.mxu1 %v3696_v40 }
  0xc5   : > { %3336 = vmatprep.subr.bf16.mxu1 %v3699_v43 }
  0xc7   : > { %631 = vmatmul.mubr.bf16.gmra.mrb[12].mxu0 %v4302_v14  ;;  %3321 = vmatmul.mubr.bf16.gmra.mrb[8].mxu1 %v3698_v42 }
  0xc8   : > { %638 = vmatprep.mubr.bf16.mxu0 %v4311_v18  ;;  %3337 = vmatpush3.bf16.msra.mxu1 %v3699_v43 }
  0xc9   : > { %3338 = vmatprep.subr.bf16.mxu1 %v3700_v44  ;;  %3324 = vmatprep.mubr.bf16.mxu1 %v3701_v45 }
  0xcc   : > { %3339 = vmatpush3.bf16.msra.mxu1 %v3700_v44 }
  0xcd   : > { %3340 = vmatprep.subr.bf16.mxu1 %v3703_v47 }
  0xcf   : > { %639 = vmatmul.mubr.bf16.gmra.mrb[16].mxu0 %v4309_v17  ;;  %3325 = vmatmul.mubr.bf16.gmra.mrb[12].mxu1 %v3702_v46 }
  0xd0   : > { %646 = vmatprep.mubr.bf16.mxu0 %v4315_v20  ;;  %3341 = vmatpush3.bf16.msra.mxu1 %v3703_v47 }
  0xd1   : > { %3342 = vmatprep.subr.bf16.mxu1 %v3704_v48 }
  0xd4   : > { %3343 = vmatpush3.bf16.msra.mxu1 %v3704_v48 }
  0xd7   : > { %647 = vmatmul.mubr.bf16.gmra.mrb[20].mxu0 %v4313_v19 }
  0xd8   : > { %654 = vmatprep.mubr.bf16.mxu0 %v4328_v25 }
  0xdf   : > { %655 = vmatmul.mubr.bf16.gmra.mrb[24].mxu0 %v4326_v24 }
  0xe0   : > { %662 = vmatprep.mubr.bf16.mxu0 %v4332_v27 }
  0xe7   : > { %663 = vmatmul.mubr.bf16.gmra.mrb[28].mxu0 %v4330_v26 }
 0x110   : > { %v674_v49 = vpop.permute.xlu0 %673  ;;  %v684_v59 = vpop.permute.xlu1 %683 }
 0x114   : > { %v679_v55 = vpop.permute.xlu0 %678  ;;  %v689_v3 = vpop.permute.xlu1 %688 }
 0x118   : > { %v694_v45 = vpop.permute.xlu0 %693  ;;  %v699_v46 = vpop.permute.xlu1 %698 }
 0x182   : > { %v3024_v50 = vpop.f32.mrb[0].mxu0 }
 0x183   : > { %v3025_v51 = vpop.f32.mrb[1].mxu0 }
 0x184   : > { %v3026_v52 = vadd.f32 %v3025_v51, %v3024_v50  ;;  %v3027_v53 = vpop.f32.mrb[2].mxu0 }
 0x185   : > { %v3028_v54 = vpop.f32.mrb[3].mxu0 }
 0x186   : > { %v3029_v56 = vadd.f32 %v3028_v54, %v3027_v53  ;;  %v751_v57 = vmul.f32 %v3026_v52, %v674_v49 }
 0x188   : > { %v752_v58 = vmul.f32 %v3029_v56, %v679_v55  ;;  %v704_v56 = vpop.permute.xlu0 %703 }
 0x18a   : > { %v767_v60 = vpack.c.bf16 %v752_v58, %v751_v57  ;;  %v3030_v61 = vpop.f32.mrb[4].mxu0  ;;  %v709_v57 = vpop.permute.xlu1 %708 }
 0x18b   : > { %v3031_v62 = vpop.f32.mrb[5].mxu0 }
 0x18c   : > { %v3032_v63 = vadd.f32 %v3031_v62, %v3030_v61  ;;  %v3033_v0 = vpop.f32.mrb[6].mxu0  ;;  %3344 = vmatprep.mubr.bf16.mxu1 %v767_v60 }
 0x18d   : > { %v3034_v1 = vpop.f32.mrb[7].mxu0 }
 0x18e   : > { %v3035_v2 = vadd.f32 %v3034_v1, %v3033_v0  ;;  %v753_v4 = vmul.f32 %v3032_v63, %v684_v59 }
 0x190   : > { %v754_v5 = vmul.f32 %v3035_v2, %v689_v3  ;;  %v714_v3 = vpop.permute.xlu0 %713 }
 0x192   : > { %v768_v10 = vpack.c.bf16 %v754_v5, %v753_v4  ;;  %v3036_v11 = vpop.f32.mrb[8].mxu0  ;;  %v719_v4 = vpop.permute.xlu1 %718 }
 0x193   : > { %v3037_v40 = vpop.f32.mrb[9].mxu0 }
 0x194   : > { %v3038_v41 = vadd.f32 %v3037_v40, %v3036_v11  ;;  %v3039_v42 = vpop.f32.mrb[10].mxu0  ;;  %3345 = vmatmul.mubr.bf16.vlgmr.msra.gmra.mrb[0].mxu1 %v768_v10 }
 0x195   : > { %v3040_v43 = vpop.f32.mrb[11].mxu0 }
 0x196   : > { %v3041_v44 = vadd.f32 %v3040_v43, %v3039_v42  ;;  %v755_v47 = vmul.f32 %v3038_v41, %v694_v45 }
 0x198   : > { %v756_v48 = vmul.f32 %v3041_v44, %v699_v46  ;;  %v724_v46 = vpop.permute.xlu0 %723 }
 0x19a   : > { %v3042_v49 = vpop.f32.mrb[12].mxu0  ;;  %v769_v50 = vpack.c.bf16 %v756_v48, %v755_v47  ;;  %v729_v47 = vpop.permute.xlu1 %728 }
 0x19b   : > { %v3043_v51 = vpop.f32.mrb[13].mxu0 }
 0x19c   : > { %v3044_v52 = vadd.f32 %v3043_v51, %v3042_v49  ;;  %v3045_v53 = vpop.f32.mrb[14].mxu0  ;;  %3348 = vmatprep.mubr.bf16.mxu1 %v769_v50 }
 0x19d   : > { %v3046_v54 = vpop.f32.mrb[15].mxu0 }
 0x19e   : > { %v3047_v55 = vadd.f32 %v3046_v54, %v3045_v53  ;;  %v757_v58 = vmul.f32 %v3044_v52, %v704_v56 }
 0x1a0   : > { %v758_v59 = vmul.f32 %v3047_v55, %v709_v57  ;;  %v734_v57 = vpop.permute.xlu0 %733 }
 0x1a2   : > { %v3048_v60 = vpop.f32.mrb[16].mxu0  ;;  %v770_v61 = vpack.c.bf16 %v758_v59, %v757_v58  ;;  %v739_v58 = vpop.permute.xlu1 %738 }
 0x1a3   : > { %v3049_v62 = vpop.f32.mrb[17].mxu0 }
 0x1a4   : > { %v3050_v63 = vadd.f32 %v3049_v62, %v3048_v60  ;;  %v3051_v0 = vpop.f32.mrb[18].mxu0  ;;  %3349 = vmatmul.mubr.bf16.gmra.mrb[4].mxu1 %v770_v61 }
 0x1a5   : > { %v3052_v1 = vpop.f32.mrb[19].mxu0 }
 0x1a6   : > { %v3053_v2 = vadd.f32 %v3052_v1, %v3051_v0  ;;  %v759_v5 = vmul.f32 %v3050_v63, %v714_v3 }
 0x1a8   : > { %v760_v10 = vmul.f32 %v3053_v2, %v719_v4  ;;  %v744_v4 = vpop.permute.xlu0 %743 }
 0x1aa   : > { %v3054_v11 = vpop.f32.mrb[20].mxu0  ;;  %v771_v40 = vpack.c.bf16 %v760_v10, %v759_v5  ;;  %v749_v5 = vpop.permute.xlu1 %748 }
 0x1ab   : > { %v3055_v41 = vpop.f32.mrb[21].mxu0 }
 0x1ac   : > { %v3056_v42 = vadd.f32 %v3055_v41, %v3054_v11  ;;  %v3057_v43 = vpop.f32.mrb[22].mxu0  ;;  %3352 = vmatprep.mubr.bf16.mxu1 %v771_v40  ;;  %v1184_v41 = vlaneseq }
 0x1ad   : > { %v3058_v44 = vpop.f32.mrb[23].mxu0 }
 0x1ae   : > { %v3059_v45 = vadd.f32 %v3058_v44, %v3057_v43  ;;  %v761_v48 = vmul.f32 %v3056_v42, %v724_v46  ;;  %v4430_v42 = vshrl.u32 %v1184_v41, 7  ;;  %v4434_v44 = vstv %s4264_s16 }
 0x1b0   : > { %v762_v49 = vmul.f32 %v3059_v45, %v729_v47  ;;  %v1187_v43 = vadd.s32 16, %v4430_v42  ;;  %v1188_v45 = vadd.s32 24, %v4430_v42  ;;  %v1186_v46 = vadd.s32 8, %v4430_v42  ;;  %v4439_v47 = vld [vmem:[%s4270_s15] ss:$0 sm:$0xff] }
 0x1b2   : > { %v3060_v50 = vpop.f32.mrb[24].mxu0  ;;  %v772_v51 = vpack.c.bf16 %v762_v49, %v761_v48  ;;  %v1204_v48 = vadd.s32 %v4434_v44, %v1187_v43  ;;  %v1202_v49 = vadd.s32 %v4434_v44, %v4430_v42 }
 0x1b3   : > { %v3061_v52 = vpop.f32.mrb[25].mxu0 }
 0x1b4   : > { %v3062_v53 = vadd.f32 %v3061_v52, %v3060_v50  ;;  %v3063_v54 = vpop.f32.mrb[26].mxu0  ;;  %3353 = vmatmul.mubr.bf16.gmra.mrb[8].mxu1 %v772_v51  ;;  %v1205_v51 = vadd.s32 %v4434_v44, %v1188_v45  ;;  %vm1220_vm0 = vcmp.lt.s32.totalorder %v1204_v48, 200  ;;  %vm1218_vm1 = vcmp.lt.s32.totalorder %v1202_v49, 200 }
 0x1b5   : > { %v3064_v55 = vpop.f32.mrb[27].mxu0 }
 0x1b6   : > { %v3065_v56 = vadd.f32 %v3064_v55, %v3063_v54  ;;  %v763_v59 = vmul.f32 %v3062_v53, %v734_v57  ;;  %v1203_v54 = vadd.s32 %v4434_v44, %v1186_v46  ;;  %vm1221_vm2 = vcmp.lt.s32.totalorder %v1205_v51, 200 }
 0x1b8   : > { %v764_v60 = vmul.f32 %v3065_v56, %v739_v58  ;;  %vm1219_vm3 = vcmp.lt.s32.totalorder %v1203_v54, 200 }
 0x1ba   : > { %v3066_v61 = vpop.f32.mrb[28].mxu0  ;;  %v773_v62 = vpack.c.bf16 %v764_v60, %v763_v59 }
 0x1bb   : > { %v3067_v63 = vpop.f32.mrb[29].mxu0 }
 0x1bc   : > { %v3068_v0 = vadd.f32 %v3067_v63, %v3066_v61  ;;  %v3069_v1 = vpop.f32.mrb[30].mxu0  ;;  %3356 = vmatprep.mubr.bf16.mxu1 %v773_v62 }
 0x1bd   : > { %v3070_v2 = vpop.f32.mrb[31].mxu0 }
 0x1be   : > { %v3071_v3 = vadd.f32 %v3070_v2, %v3069_v1  ;;  %v765_v10 = vmul.f32 %v3068_v0, %v744_v4  ;;  %v1191_v4 = vadd.s32 48, %v4430_v42 }
 0x1c0   : > { %v766_v11 = vmul.f32 %v3071_v3, %v749_v5  ;;  %v1189_v5 = vadd.s32 32, %v4430_v42 }
 0x1c2   : > { %v774_v40 = vpack.c.bf16 %v766_v11, %v765_v10  ;;  %v1192_v10 = vadd.s32 56, %v4430_v42  ;;  %v1190_v11 = vadd.s32 40, %v4430_v42  ;;  %v1206_v41 = vadd.s32 %v4434_v44, %v1189_v5 }
 0x1c3   : > { %v1196_v5 = vadd.s32 88, %v4430_v42 }
 0x1c4   : > { %3357 = vmatmul.mubr.bf16.gmra.mrb[12].mxu1 %v774_v40  ;;  %v1208_v40 = vadd.s32 %v4434_v44, %v1191_v4  ;;  %v1209_v45 = vadd.s32 %v4434_v44, %v1192_v10  ;;  %v1207_v49 = vadd.s32 %v4434_v44, %v1190_v11  ;;  %vm1222_vm5 = vcmp.lt.s32.totalorder %v1206_v41, 200 }
 0x1c5   : > { %v1193_v4 = vadd.s32 64, %v4430_v42  ;;  %v1194_v10 = vadd.s32 72, %v4430_v42 }
 0x1c6   : > { %vm1224_vm4 = vcmp.lt.s32.totalorder %v1208_v40, 200  ;;  %vm1225_vm6 = vcmp.lt.s32.totalorder %v1209_v45, 200  ;;  %vm1223_vm7 = vcmp.lt.s32.totalorder %v1207_v49, 200 }
 0x1c7   : > { %v1210_v40 = vadd.s32 %v4434_v44, %v1193_v4 }
 0x1c9   : > { %vm1226_vm9 = vcmp.lt.s32.totalorder %v1210_v40, 200  ;;  %v1200_v40 = vadd.s32 120, %v4430_v42 }
 0x267   : > { %v3346_v50 = vpop.f32.mrb[0].mxu1 }
 0x268   : > { %v1154_v52 = vadd.f32 %v3346_v50, %v4439_v47  ;;  %v1082_v53 = vpop.f32.mrb[1].mxu1 }
 0x269   : > { %v1152_v55 = vadd.f32 %v4439_v47, %v1082_v53  ;;  %v3347_v56 = vpop.f32.mrb[2].mxu1 }
 0x26a   : > { %v1170_v57 = vmax.f32 %v1154_v52, 0.0  ;;  %v1155_v58 = vadd.f32 %v3347_v56, %v4439_v47  ;;  %v1085_v59 = vpop.f32.mrb[3].mxu1 }
 0x26b   : > { %v1168_v60 = vmax.f32 %v1152_v55, 0.0  ;;  %v1153_v61 = vadd.f32 %v4439_v47, %v1085_v59 }
 0x26c   : > { %v4450_v62 = vsel %vm1220_vm0, %v1170_v57, 0.0  ;;  %v1171_v63 = vmax.f32 %v1155_v58, 0.0 }
 0x26d   : > { %v4452_v0 = vsel %vm1218_vm1, %v1168_v60, 0.0  ;;  %v1169_v1 = vmax.f32 %v1153_v61, 0.0 }
 0x26e   : > { %v4454_v2 = vsel %vm1221_vm2, %v1171_v63, 0.0 }
 0x26f   : > { %v4456_v3 = vsel %vm1219_vm3, %v1169_v1, 0.0  ;;  %v1195_v1 = vadd.s32 80, %v4430_v42 }
 0x271   : > { %v1212_v11 = vadd.s32 %v4434_v44, %v1195_v1 }
 0x273   : > { %vm1228_vm8 = vcmp.lt.s32.totalorder %v1212_v11, 200  ;;  %v1197_v11 = vadd.s32 96, %v4430_v42 }
 0x277   : > { %v3350_v43 = vpop.f32.mrb[4].mxu1 }
 0x278   : > { %v1158_v46 = vadd.f32 %v3350_v43, %v4439_v47  ;;  %v1098_v48 = vpop.f32.mrb[5].mxu1  ;;  %v1213_v43 = vadd.s32 %v4434_v44, %v1196_v5 }
 0x279   : > { %v1156_v50 = vadd.f32 %v4439_v47, %v1098_v48  ;;  %v3351_v51 = vpop.f32.mrb[6].mxu1  ;;  %v1211_v48 = vadd.s32 %v4434_v44, %v1194_v10  ;;  %v1199_v10 = vadd.s32 112, %v4430_v42 }
 0x27a   : > { %v1174_v52 = vmax.f32 %v1158_v46, 0.0  ;;  %v1159_v53 = vadd.f32 %v3351_v51, %v4439_v47  ;;  %v1101_v54 = vpop.f32.mrb[7].mxu1  ;;  %vm1229_vm10 = vcmp.lt.s32.totalorder %v1213_v43, 200 }
 0x27b   : > { %v1172_v55 = vmax.f32 %v1156_v50, 0.0  ;;  %v1157_v56 = vadd.f32 %v4439_v47, %v1101_v54  ;;  %vm1227_vm11 = vcmp.lt.s32.totalorder %v1211_v48, 200  ;;  %v1216_v43 = vadd.s32 %v4434_v44, %v1199_v10 }
 0x27c   : > { %v4470_v57 = vsel %vm1224_vm4, %v1174_v52, 0.0  ;;  %v1175_v58 = vmax.f32 %v1159_v53, 0.0  ;;  %v1217_v48 = vadd.s32 %v4434_v44, %v1200_v40 }
 0x27d   : > { %v4472_v59 = vsel %vm1222_vm5, %v1172_v55, 0.0  ;;  %v1173_v60 = vmax.f32 %v1157_v56, 0.0  ;;  %vm1232_vm12 = vcmp.lt.s32.totalorder %v1216_v43, 200  ;;  %v1255_v43 = vpack.c.bf16 (!%p2936_p9), %v4454_v2, %v4450_v62 }
 0x27e   : > { %v4474_v61 = vsel %vm1225_vm6, %v1175_v58, 0.0  ;;  %vm1233_vm14 = vcmp.lt.s32.totalorder %v1217_v48, 200 }
 0x27f   : > { %v4476_v63 = vsel %vm1223_vm7, %v1173_v60, 0.0  ;;  %1267 = vst [vmem:[%s1265_s0 + $0x8] sm:$0xff] (!%p2936_p9), %v1255_v43 }
 0x287   : > { %v3354_v41 = vpop.f32.mrb[8].mxu1 }
 0x288   : > { %v1162_v45 = vadd.f32 %v3354_v41, %v4439_v47  ;;  %v1114_v46 = vpop.f32.mrb[9].mxu1  ;;  %v1198_v41 = vadd.s32 104, %v4430_v42 }
 0x289   : > { %v1160_v49 = vadd.f32 %v4439_v47, %v1114_v46  ;;  %v3355_v50 = vpop.f32.mrb[10].mxu1 }
 0x28a   : > { %v1178_v51 = vmax.f32 %v1162_v45, 0.0  ;;  %v1163_v52 = vadd.f32 %v3355_v50, %v4439_v47  ;;  %v1117_v53 = vpop.f32.mrb[11].mxu1  ;;  %v1214_v45 = vadd.s32 %v4434_v44, %v1197_v11 }
 0x28b   : > { %v1176_v54 = vmax.f32 %v1160_v49, 0.0  ;;  %v1161_v55 = vadd.f32 %v4439_v47, %v1117_v53 }
 0x28c   : > { %v4490_v56 = vsel %vm1228_vm8, %v1178_v51, 0.0  ;;  %v1179_v58 = vmax.f32 %v1163_v52, 0.0  ;;  %v1215_v51 = vadd.s32 %v4434_v44, %v1198_v41  ;;  %vm1230_vm13 = vcmp.lt.s32.totalorder %v1214_v45, 200 }
 0x28d   : > { %v4492_v60 = vsel %vm1226_vm9, %v1176_v54, 0.0  ;;  %v1177_v1 = vmax.f32 %v1161_v55, 0.0  ;;  %v1254_v41 = vpack.c.bf16 (!%p2936_p9), %v4456_v3, %v4452_v0  ;;  %v1257_v45 = vpack.c.bf16 (!%p2936_p9), %v4474_v61, %v4470_v57 }
 0x28e   : > { %v4494_v4 = vsel %vm1229_vm10, %v1179_v58, 0.0  ;;  %vm1231_vm15 = vcmp.lt.s32.totalorder %v1215_v51, 200 }
 0x28f   : > { %v1243_v5 = vsel %vm1227_vm11, %v1177_v1, 0.0  ;;  %1266 = vst [vmem:[%s1265_s0] sm:$0xff] (!%p2936_p9), %v1254_v41  ;;  %1269 = vst [vmem:[%s1265_s0 + $0x18] sm:$0xff] (!%p2936_p9), %v1257_v45 }
 0x290   : > { %v1258_v48 = vpack.c.bf16 (!%p2936_p9), %v1243_v5, %v4492_v60 }
 0x292   : > { %1270 = vst [vmem:[%s1265_s0 + $0x20] sm:$0xff] (!%p2936_p9), %v1258_v48 }
 0x297   : > { %v3358_v46 = vpop.f32.mrb[12].mxu1 }
 0x298   : > { %v1166_v49 = vadd.f32 %v3358_v46, %v4439_v47  ;;  %v1130_v50 = vpop.f32.mrb[13].mxu1 }
 0x299   : > { %v1164_v52 = vadd.f32 %v4439_v47, %v1130_v50  ;;  %v3359_v53 = vpop.f32.mrb[14].mxu1  ;;  %1253 = sbr.rel (%p2936_p9) target bundleno = 675 (0x2a3), region = 64 }
 0x29a   : > { %v1182_v54 = vmax.f32 %v1166_v49, 0.0  ;;  %v1167_v42 = vadd.f32 %v3359_v53, %v4439_v47  ;;  %v1133_v55 = vpop.f32.mrb[15].mxu1  ;;  %v1259_v49 = vpack.c.bf16 (!%p2936_p9), %v4494_v4, %v4490_v56 }
 0x29b   : > { %v1180_v58 = vmax.f32 %v1164_v52, 0.0  ;;  %v1165_v1 = vadd.f32 %v4439_v47, %v1133_v55  ;;  %v1256_v47 = vpack.c.bf16 (!%p2936_p9), %v4476_v63, %v4472_v59 }
 0x29c   : > { %v1248_v10 = vsel %vm1232_vm12, %v1182_v54, 0.0  ;;  %v1183_v11 = vmax.f32 %v1167_v42, 0.0  ;;  %1271 = vst [vmem:[%s1265_s0 + $0x28] sm:$0xff] (!%p2936_p9), %v1259_v49 }
 0x29d   : > { %v1246_v40 = vsel %vm1230_vm13, %v1180_v58, 0.0  ;;  %v1181_v46 = vmax.f32 %v1165_v1, 0.0  ;;  %1268 = vst [vmem:[%s1265_s0 + $0x10] sm:$0xff] (!%p2936_p9), %v1256_v47 }
 0x29e   : > { %v1249_v26 = vsel %vm1233_vm14, %v1183_v11, 0.0 }
 0x29f   : > { %v1247_v44 = vsel %vm1231_vm15, %v1181_v46, 0.0  ;;  %v1261_v51 = vpack.c.bf16 (!%p2936_p9), %v1249_v26, %v1248_v10 }
 0x2a0   : > { %v1260_v50 = vpack.c.bf16 %v1247_v44, %v1246_v40 }
 0x2a1   : > { %1273 = vst [vmem:[%s1265_s0 + $0x38] sm:$0xff] %v1261_v51 }
 0x2a2   : > { %1272 = vst [vmem:[%s1265_s0 + $0x30] sm:$0xff] %v1260_v50 }
 0x2a3 PF: > { %p2938_p11 = scmp.ne.s32.totalorder %s3945_s28, 2 }
 0x2a4   : > { %s1278_s11 = scalar_lea.vmem (!%p2938_p11), [#allocation9], %s4264_s16 }
 0x2a5   : > { %1277 = sbr.rel (%p2938_p11) target bundleno = 685 (0x2ad), region = 68  ;;  %1279 = vst [vmem:[%s1278_s11] sm:$0xff] (!%p2938_p11), %v4452_v0  ;;  %1280 = vst [vmem:[%s1278_s11 + $0x8] sm:$0xff] (!%p2938_p11), %v4456_v3 }
 0x2a6   : > { %1281 = vst [vmem:[%s1278_s11 + $0x10] sm:$0xff] (!%p2938_p11), %v4450_v62  ;;  %1282 = vst [vmem:[%s1278_s11 + $0x18] sm:$0xff] (!%p2938_p11), %v4454_v2 }
 0x2a7   : > { %1283 = vst [vmem:[%s1278_s11 + $0x20] sm:$0xff] (!%p2938_p11), %v4472_v59  ;;  %1284 = vst [vmem:[%s1278_s11 + $0x28] sm:$0xff] (!%p2938_p11), %v4476_v63 }
 0x2a8   : > { %1285 = vst [vmem:[%s1278_s11 + $0x30] sm:$0xff] (!%p2938_p11), %v4470_v57  ;;  %1286 = vst [vmem:[%s1278_s11 + $0x38] sm:$0xff] (!%p2938_p11), %v4474_v61 }
 0x2a9   : > { %1287 = vst [vmem:[%s1278_s11 + $0x40] sm:$0xff] (!%p2938_p11), %v4492_v60  ;;  %1288 = vst [vmem:[%s1278_s11 + $0x48] sm:$0xff] (!%p2938_p11), %v1243_v5 }
 0x2aa   : > { %1289 = vst [vmem:[%s1278_s11 + $0x50] sm:$0xff] (!%p2938_p11), %v4490_v56  ;;  %1290 = vst [vmem:[%s1278_s11 + $0x58] sm:$0xff] (!%p2938_p11), %v4494_v4 }
 0x2ab   : > { %1291 = vst [vmem:[%s1278_s11 + $0x60] sm:$0xff] (!%p2938_p11), %v1246_v40  ;;  %1292 = vst [vmem:[%s1278_s11 + $0x68] sm:$0xff] (!%p2938_p11), %v1247_v44 }
 0x2ac   : > { %1293 = vst [vmem:[%s1278_s11 + $0x70] sm:$0xff] %v1248_v10  ;;  %1294 = vst [vmem:[%s1278_s11 + $0x78] sm:$0xff] %v1249_v26 }
 0x2ad PF: > { %p1296_p13 = scmp.lt.s32.totalorder %s3945_s28, 0  ;;  %s1297_s24 = ssub.s32 0, %s3945_s28 }
 0x2ae   : > { %s2939_s6 = smin.u32 %s3945_s28, %s1297_s24  ;;  %p1295_p3 = scmp.gt.s32.totalorder %s3945_s28, 0 }
 0x2af   : > { %s1299_s21 = sand.u32 1, %s2939_s6  }
 0x2b0   : > { %s1300_s29 = ssub.s32 0, %s1299_s21 }
 0x2b1   : > { %s4992_s29 = smov (!%p1296_p13, %s1300_s29), %s1299_s21 }
 0x2b2   : > { %p2941_p8 = scmp.lt.s32.totalorder %s4992_s29, 0  ;;  %s1306_s13 = sadd.s32 2, %s4992_s29 }
 0x2b4   : > { %s4994_s13 = smov (!%p2941_p8, %s1306_s13), %s4992_s29 }
 0x2b5   : > { %p1308_p7 = scmp.eq.s32.totalorder %s4994_s13, 1 }
 0x2b7   : > { %p1309_p2 = pnand %p1308_p7, %p1295_p3 }
 0x2b8   : > { %v1321_v26 = vld [vmem:[#allocation2 + $0x40] sm:$0xff] (!%p1309_p2)  ;;  %v1322_v0 = vld [vmem:[#allocation2 + $0x48] sm:$0xff] (!%p1309_p2)  ;;  %1373 = vmatprep.mubr.bf16.mxu0 (!%p1309_p2), %v4290_v7  ;;  %v3967_v2 = vmov (!%p1309_p2), 0   ;;  %v1323_v57 = vld [vmem:[#allocation2 + $0x50] sm:$0xff] (!%p1309_p2)  ;;  %s1329_s27 = sshra.s32 (!%p1309_p2), %s4264_s16, 4  ;;  %p2960_p10 = scmp.ge.s32.totalorder (!%p1309_p2), %s3945_s28, 2 }
 0x2b9   : > { %1312 = sbr.rel (%p1309_p2) target bundleno = 1239 (0x4d7), region = 72  ;;  %v1313_v62 = vld [vmem:[#allocation2] sm:$0xff] (!%p1309_p2)  ;;  %3104 = vmatprep.subr.bf16.mxu0 (!%p1309_p2), %v1321_v26  ;;  %3705 = vset.pattern.permute.xlu0 (!%p1309_p2), %v3967_v2  ;;  %v1314_v3 = vld [vmem:[#allocation2 + $0x8] sm:$0xff] (!%p1309_p2)  ;;  %v1315_v59 = vld [vmem:[#allocation2 + $0x10] sm:$0xff] (!%p1309_p2)  ;;  %s2942_s26 = sshll.u32 (!%p1309_p2), %s1329_s27, 3 }
 0x2ba   : > { %3105 = vmatpush3.bf16.msra.mxu0 (!%p1309_p2), %v1313_v62  ;;  %1440 = vperm.xlu0 (!%p1309_p2), %3705, %v4307_v16   ;;  %v3707_v61 = vld [vmem:[%s4255_s12] sm:$0xff] (!%p1309_p2)   ;;  %v3708_v63 = vld [vmem:[%s4255_s12 + $0x8] sm:$0xff] (!%p1309_p2)   ;;  %v1324_v56 = vld [vmem:[#allocation2 + $0x58] sm:$0xff] (!%p1309_p2)  ;;  %s4554_s19 = scalar_lea.vmem (!%p1309_p2), [#allocation2], %s2942_s26 }
 0x2bb   : > { %3106 = vmatprep.subr.bf16.mxu0 (!%p1309_p2), %v1322_v0  ;;  %3706 = vset.pattern.permute.xlu1 (!%p1309_p2), %v3967_v2  ;;  %v1316_v60 = vld [vmem:[#allocation2 + $0x18] sm:$0xff] (!%p1309_p2)  ;;  %v3709_v4 = vld [vmem:[%s4255_s12 + $0x10] sm:$0xff] (!%p1309_p2)   ;;  %v1325_v5 = vld [vmem:[#allocation2 + $0x60] sm:$0xff] (!%p1309_p2) }
 0x2bc   : > { %1450 = vperm.xlu1 (!%p1309_p2), %3706, %v4321_v22   ;;  %3360 = vmatprep.subr.bf16.mxu1 (!%p1309_p2), %v3707_v61  ;;  %v1333_v52 = vld [vmem:[%s4554_s19] sm:$0xff] (!%p1309_p2)  ;;  %v3710_v54 = vld [vmem:[%s4255_s12 + $0x18] sm:$0xff] (!%p1309_p2)   ;;  %v1326_v42 = vld [vmem:[#allocation2 + $0x68] sm:$0xff] (!%p1309_p2) }
 0x2bd   : > { %3361 = vmatpush3.bf16.msra.mxu1 (!%p1309_p2), %v3707_v61  ;;  %v1317_v53 = vld [vmem:[#allocation2 + $0x20] sm:$0xff] (!%p1309_p2)  ;;  %3376 = vmatprep.mubr.bf16.mxu1 (!%p1309_p2), %v1333_v52  ;;  %v1318_v55 = vld [vmem:[#allocation2 + $0x28] sm:$0xff] (!%p1309_p2)  ;;  %v1327_v58 = vld [vmem:[#allocation2 + $0x70] sm:$0xff] (!%p1309_p2) }
 0x2be   : > { %3107 = vmatpush3.bf16.msra.mxu0 (!%p1309_p2), %v1314_v3  ;;  %1445 = vperm.xlu0 (!%p1309_p2), %3705, %v4318_v21   ;;  %v3711_v1 = vld [vmem:[%s4255_s12 + $0x20] sm:$0xff] (!%p1309_p2)   ;;  %v1319_v10 = vld [vmem:[#allocation2 + $0x30] sm:$0xff] (!%p1309_p2)  ;;  %v3712_v11 = vld [vmem:[%s4255_s12 + $0x28] sm:$0xff] (!%p1309_p2)  }
 0x2bf   : > { %3108 = vmatprep.subr.bf16.mxu0 (!%p1309_p2), %v1323_v57  ;;  %3362 = vmatprep.subr.bf16.mxu1 (!%p1309_p2), %v3708_v63  ;;  %v1328_v40 = vld [vmem:[#allocation2 + $0x78] sm:$0xff] (!%p1309_p2)  ;;  %v3713_v44 = vld [vmem:[%s4255_s12 + $0x30] sm:$0xff] (!%p1309_p2)   ;;  %v3715_v43 = vld [vmem:[%s4275_s10] sm:$0xff] (!%p1309_p2)  }
 0x2c0   : > { %1455 = vperm.xlu1 %3706, %v4324_v23   ;;  %v1320_v46 = vld [vmem:[#allocation2 + $0x38] sm:$0xff]  ;;  %v1334_v47 = vld [vmem:[%s4554_s19 + $0x8] sm:$0xff]  ;;  %v1335_v48 = vld [vmem:[%s4554_s19 + $0x10] sm:$0xff] }
 0x2c1   : > { %3363 = vmatpush3.bf16.msra.mxu1 %v3708_v63  ;;  %v3714_v41 = vld [vmem:[%s4255_s12 + $0x38] sm:$0xff]   ;;  %v3716_v45 = vld [vmem:[%s4275_s10 + $0x8] sm:$0xff]   ;;  %v3717_v49 = vld [vmem:[%s4275_s10 + $0x10] sm:$0xff]  }
 0x2c2   : > { %3109 = vmatpush3.bf16.msra.mxu0 %v1315_v59  ;;  %1460 = vperm.xlu0 %3705, %v4335_v28   ;;  %v1336_v50 = vld [vmem:[%s4554_s19 + $0x18] sm:$0xff]  ;;  %v4968_v26 = vld [vmem:[#allocation18_spill] sm:$0xff]  ;;  %v1338_v0 = vld [vmem:[%s4554_s19 + $0x28] sm:$0xff] }
 0x2c3   : > { %3110 = vmatprep.subr.bf16.mxu0 %v1324_v56  ;;  %3364 = vmatprep.subr.bf16.mxu1 %v3709_v4  ;;  %v3718_v51 = vld [vmem:[%s4275_s10 + $0x18] sm:$0xff]   ;;  %v1337_v62 = vld [vmem:[%s4554_s19 + $0x20] sm:$0xff]  ;;  %v3720_v3 = vld [vmem:[%s4275_s10 + $0x28] sm:$0xff]  }
 0x2c4   : > { %1465 = vperm.xlu1 %3706, %v4338_v29   ;;  %v3719_v2 = vld [vmem:[%s4275_s10 + $0x20] sm:$0xff]   ;;  %v1339_v57 = vld [vmem:[%s4554_s19 + $0x30] sm:$0xff]  ;;  %v1340_v59 = vld [vmem:[%s4554_s19 + $0x38] sm:$0xff] }
 0x2c5   : > { %3365 = vmatpush3.bf16.msra.mxu1 %v3709_v4  ;;  %v3721_v61 = vld [vmem:[%s4275_s10 + $0x30] sm:$0xff]   ;;  %v3722_v63 = vld [vmem:[%s4275_s10 + $0x38] sm:$0xff]  }
 0x2c6   : > { %3111 = vmatpush3.bf16.msra.mxu0 %v1316_v60  ;;  %1470 = vperm.xlu0 %3705, %v4341_v30  }
 0x2c7   : > { %3112 = vmatprep.subr.bf16.mxu0 %v1325_v5  ;;  %3366 = vmatprep.subr.bf16.mxu1 %v3710_v54 }
 0x2c8   : > { %1475 = vperm.xlu1 %3706, %v4344_v31  }
 0x2c9   : > { %3367 = vmatpush3.bf16.msra.mxu1 %v3710_v54 }
 0x2ca   : > { %3113 = vmatpush3.bf16.msra.mxu0 %v1317_v53  ;;  %1480 = vperm.xlu0 %3705, %v4347_v32  }
 0x2cb   : > { %3114 = vmatprep.subr.bf16.mxu0 %v1326_v42  ;;  %3368 = vmatprep.subr.bf16.mxu1 %v3711_v1 }
 0x2cc   : > { %1485 = vperm.xlu1 %3706, %v4350_v33  }
 0x2cd   : > { %3369 = vmatpush3.bf16.msra.mxu1 %v3711_v1 }
 0x2ce   : > { %3115 = vmatpush3.bf16.msra.mxu0 %v1318_v55  ;;  %1490 = vperm.xlu0 %3705, %v4353_v34  }
 0x2cf   : > { %3116 = vmatprep.subr.bf16.mxu0 %v1327_v58  ;;  %3370 = vmatprep.subr.bf16.mxu1 %v3712_v11 }
 0x2d0   : > { %1495 = vperm.xlu1 %3706, %v4356_v35  }
 0x2d1   : > { %3371 = vmatpush3.bf16.msra.mxu1 %v3712_v11 }
 0x2d2   : > { %3117 = vmatpush3.bf16.msra.mxu0 %v1319_v10  ;;  %1500 = vperm.xlu0 %3705, %v4359_v36  }
 0x2d3   : > { %3118 = vmatprep.subr.bf16.mxu0 %v1328_v40  ;;  %3372 = vmatprep.subr.bf16.mxu1 %v3713_v44 }
 0x2d4   : > { %1505 = vperm.xlu1 %3706, %v4362_v37  }
 0x2d5   : > { %3373 = vmatpush3.bf16.msra.mxu1 %v3713_v44 }
 0x2d6   : > { %3119 = vmatpush3.bf16.msra.mxu0 %v1320_v46  ;;  %1510 = vperm.xlu0 %3705, %v4365_v38  }
 0x2d7   : > { %3374 = vmatprep.subr.bf16.mxu1 %v3714_v41 }
 0x2d8   : > { %1515 = vperm.xlu1 %3706, %v4368_v39  }
 0x2d9   : > { %1374 = vmatmul.mubr.bf16.vlgmr.msra.gmra.mrb[0].mxu0 %v4288_v6  ;;  %3375 = vmatpush3.bf16.msra.mxu1 %v3714_v41 }
 0x2da   : > { %1381 = vmatprep.mubr.bf16.mxu0 %v4294_v9  ;;  %3392 = vmatprep.subr.bf16.mxu1 %v3715_v43 }
 0x2dc   : > { %3377 = vmatmul.mubr.bf16.vlgmr.msra.gmra.mrb[0].mxu1 %v1334_v47 }
 0x2dd   : > { %3393 = vmatpush3.bf16.msra.mxu1 %v3715_v43  ;;  %3380 = vmatprep.mubr.bf16.mxu1 %v1335_v48 }
 0x2de   : > { %3394 = vmatprep.subr.bf16.mxu1 %v3716_v45 }
 0x2e1   : > { %1382 = vmatmul.mubr.bf16.gmra.mrb[4].mxu0 %v4292_v8  ;;  %3395 = vmatpush3.bf16.msra.mxu1 %v3716_v45 }
 0x2e2   : > { %1389 = vmatprep.mubr.bf16.mxu0 %v4300_v13  ;;  %3396 = vmatprep.subr.bf16.mxu1 %v3717_v49 }
 0x2e4   : > { %3381 = vmatmul.mubr.bf16.gmra.mrb[4].mxu1 %v1336_v50 }
 0x2e5   : > { %3397 = vmatpush3.bf16.msra.mxu1 %v3717_v49  ;;  %3384 = vmatprep.mubr.bf16.mxu1 %v1337_v62 }
 0x2e6   : > { %3398 = vmatprep.subr.bf16.mxu1 %v3718_v51 }
 0x2e9   : > { %1390 = vmatmul.mubr.bf16.gmra.mrb[8].mxu0 %v4298_v12  ;;  %3399 = vmatpush3.bf16.msra.mxu1 %v3718_v51 }
 0x2ea   : > { %1397 = vmatprep.mubr.bf16.mxu0 %v4304_v15  ;;  %3400 = vmatprep.subr.bf16.mxu1 %v3719_v2 }
 0x2ec   : > { %3385 = vmatmul.mubr.bf16.gmra.mrb[8].mxu1 %v1338_v0 }
 0x2ed   : > { %3401 = vmatpush3.bf16.msra.mxu1 %v3719_v2  ;;  %3388 = vmatprep.mubr.bf16.mxu1 %v1339_v57 }
 0x2ee   : > { %3402 = vmatprep.subr.bf16.mxu1 %v3720_v3 }
 0x2f1   : > { %1398 = vmatmul.mubr.bf16.gmra.mrb[12].mxu0 %v4302_v14  ;;  %3403 = vmatpush3.bf16.msra.mxu1 %v3720_v3 }
 0x2f2   : > { %1405 = vmatprep.mubr.bf16.mxu0 %v4311_v18  ;;  %3404 = vmatprep.subr.bf16.mxu1 %v3721_v61 }
 0x2f4   : > { %3389 = vmatmul.mubr.bf16.gmra.mrb[12].mxu1 %v1340_v59 }
 0x2f5   : > { %3405 = vmatpush3.bf16.msra.mxu1 %v3721_v61 }
 0x2f6   : > { %3406 = vmatprep.subr.bf16.mxu1 %v3722_v63 }
 0x2f9   : > { %1406 = vmatmul.mubr.bf16.gmra.mrb[16].mxu0 %v4309_v17  ;;  %3407 = vmatpush3.bf16.msra.mxu1 %v3722_v63 }
 0x2fa   : > { %1413 = vmatprep.mubr.bf16.mxu0 %v4315_v20 }
 0x301   : > { %1414 = vmatmul.mubr.bf16.gmra.mrb[20].mxu0 %v4313_v19 }
 0x302   : > { %1421 = vmatprep.mubr.bf16.mxu0 %v4328_v25 }
 0x309   : > { %1422 = vmatmul.mubr.bf16.gmra.mrb[24].mxu0 %v4326_v24 }
 0x30a   : > { %1429 = vmatprep.mubr.bf16.mxu0 %v4332_v27 }
 0x311   : > { %1430 = vmatmul.mubr.bf16.gmra.mrb[28].mxu0 %v4968_v26 }
 0x339   : > { %v1441_v56 = vpop.permute.xlu0 %1440 }
 0x33b   : > { %v1451_v1 = vpop.permute.xlu1 %1450 }
 0x33d   : > { %v1446_v54 = vpop.permute.xlu0 %1445 }
 0x33f   : > { %v1456_v47 = vpop.permute.xlu1 %1455 }
 0x341   : > { %v1461_v3 = vpop.permute.xlu0 %1460 }
 0x343   : > { %v1466_v57 = vpop.permute.xlu1 %1465 }
 0x3ac   : > { %v3120_v60 = vpop.f32.mrb[0].mxu0 }
 0x3ad   : > { %v3121_v4 = vpop.f32.mrb[1].mxu0 }
 0x3ae   : > { %v3122_v5 = vadd.f32 %v3121_v4, %v3120_v60  ;;  %v3123_v52 = vpop.f32.mrb[2].mxu0 }
 0x3af   : > { %v3124_v53 = vpop.f32.mrb[3].mxu0 }
 0x3b0   : > { %v3125_v42 = vadd.f32 %v3124_v53, %v3123_v52  ;;  %v1518_v55 = vmul.f32 %v3122_v5, %v1441_v56 }
 0x3b2   : > { %v1519_v58 = vmul.f32 %v3125_v42, %v1446_v54  ;;  %v1471_v54 = vpop.permute.xlu0 %1470  ;;  %v1476_v42 = vpop.permute.xlu1 %1475 }
 0x3b4   : > { %v1534_v10 = vpack.c.bf16 %v1519_v58, %v1518_v55  ;;  %v3126_v11 = vpop.f32.mrb[4].mxu0 }
 0x3b5   : > { %v3127_v40 = vpop.f32.mrb[5].mxu0 }
 0x3b6   : > { %v3128_v46 = vadd.f32 %v3127_v40, %v3126_v11  ;;  %v3129_v44 = vpop.f32.mrb[6].mxu0  ;;  %3408 = vmatprep.mubr.bf16.mxu1 %v1534_v10 }
 0x3b7   : > { %v3130_v41 = vpop.f32.mrb[7].mxu0 }
 0x3b8   : > { %v3131_v43 = vadd.f32 %v3130_v41, %v3129_v44  ;;  %v1520_v45 = vmul.f32 %v3128_v46, %v1451_v1 }
 0x3ba   : > { %v1521_v48 = vmul.f32 %v3131_v43, %v1456_v47  ;;  %v1481_v43 = vpop.permute.xlu0 %1480  ;;  %v1486_v47 = vpop.permute.xlu1 %1485 }
 0x3bc   : > { %v1535_v49 = vpack.c.bf16 %v1521_v48, %v1520_v45  ;;  %v3132_v50 = vpop.f32.mrb[8].mxu0 }
 0x3bd   : > { %v3133_v51 = vpop.f32.mrb[9].mxu0 }
 0x3be   : > { %v3134_v26 = vadd.f32 %v3133_v51, %v3132_v50  ;;  %v3135_v62 = vpop.f32.mrb[10].mxu0  ;;  %3409 = vmatmul.mubr.bf16.vlgmr.msra.gmra.mrb[0].mxu1 %v1535_v49 }
 0x3bf   : > { %v3136_v0 = vpop.f32.mrb[11].mxu0 }
 0x3c0   : > { %v3137_v2 = vadd.f32 %v3136_v0, %v3135_v62  ;;  %v1522_v59 = vmul.f32 %v3134_v26, %v1461_v3  ;;  %v1491_v3 = vpop.permute.xlu0 %1490 }
 0x3c2   : > { %v1523_v61 = vmul.f32 %v3137_v2, %v1466_v57  ;;  %v1496_v57 = vpop.permute.xlu1 %1495 }
 0x3c4   : > { %v3138_v63 = vpop.f32.mrb[12].mxu0  ;;  %v1536_v56 = vpack.c.bf16 %v1523_v61, %v1522_v59 }
 0x3c5   : > { %v3139_v60 = vpop.f32.mrb[13].mxu0 }
 0x3c6   : > { %v3140_v4 = vadd.f32 %v3139_v60, %v3138_v63  ;;  %v3141_v5 = vpop.f32.mrb[14].mxu0  ;;  %3412 = vmatprep.mubr.bf16.mxu1 %v1536_v56 }
 0x3c7   : > { %v3142_v52 = vpop.f32.mrb[15].mxu0 }
 0x3c8   : > { %v3143_v53 = vadd.f32 %v3142_v52, %v3141_v5  ;;  %v1524_v55 = vmul.f32 %v3140_v4, %v1471_v54  ;;  %v1501_v54 = vpop.permute.xlu0 %1500 }
 0x3ca   : > { %v1525_v58 = vmul.f32 %v3143_v53, %v1476_v42  ;;  %v1506_v42 = vpop.permute.xlu1 %1505 }
 0x3cc   : > { %v3144_v1 = vpop.f32.mrb[16].mxu0  ;;  %v1537_v10 = vpack.c.bf16 %v1525_v58, %v1524_v55 }
 0x3cd   : > { %v3145_v11 = vpop.f32.mrb[17].mxu0 }
 0x3ce   : > { %v3146_v40 = vadd.f32 %v3145_v11, %v3144_v1  ;;  %v3147_v46 = vpop.f32.mrb[18].mxu0  ;;  %3413 = vmatmul.mubr.bf16.gmra.mrb[4].mxu1 %v1537_v10 }
 0x3cf   : > { %v3148_v44 = vpop.f32.mrb[19].mxu0 }
 0x3d0   : > { %v3149_v41 = vadd.f32 %v3148_v44, %v3147_v46  ;;  %v1526_v45 = vmul.f32 %v3146_v40, %v1481_v43  ;;  %v1511_v43 = vpop.permute.xlu0 %1510 }
 0x3d2   : > { %v1527_v48 = vmul.f32 %v3149_v41, %v1486_v47  ;;  %v1516_v47 = vpop.permute.xlu1 %1515 }
 0x3d4   : > { %v3150_v49 = vpop.f32.mrb[20].mxu0  ;;  %v1538_v50 = vpack.c.bf16 %v1527_v48, %v1526_v45 }
 0x3d5   : > { %v3151_v51 = vpop.f32.mrb[21].mxu0 }
 0x3d6   : > { %v3152_v26 = vadd.f32 %v3151_v51, %v3150_v49  ;;  %v3153_v62 = vpop.f32.mrb[22].mxu0  ;;  %3416 = vmatprep.mubr.bf16.mxu1 %v1538_v50  ;;  %v1903_v50 = vlaneseq }
 0x3d7   : > { %v3154_v0 = vpop.f32.mrb[23].mxu0 }
 0x3d8   : > { %v3155_v2 = vadd.f32 %v3154_v0, %v3153_v62  ;;  %v1528_v59 = vmul.f32 %v3152_v26, %v1491_v3  ;;  %v4602_v51 = vshrl.u32 %v1903_v50, 7  ;;  %v4606_v62 = vstv %s4264_s16  ;;  %v4611_v3 = vld [vmem:[%s4270_s15] ss:$0 sm:$0xff] }
 0x3da   : > { %v1529_v61 = vmul.f32 %v3155_v2, %v1496_v57  ;;  %v1906_v26 = vadd.s32 16, %v4602_v51  ;;  %v1907_v0 = vadd.s32 24, %v4602_v51  ;;  %v1905_v2 = vadd.s32 8, %v4602_v51 }
 0x3dc   : > { %v3156_v63 = vpop.f32.mrb[24].mxu0  ;;  %v1539_v56 = vpack.c.bf16 %v1529_v61, %v1528_v59  ;;  %v1923_v57 = vadd.s32 %v4606_v62, %v1906_v26  ;;  %v1921_v59 = vadd.s32 %v4606_v62, %v4602_v51 }
 0x3dd   : > { %v3157_v60 = vpop.f32.mrb[25].mxu0 }
 0x3de   : > { %v3158_v4 = vadd.f32 %v3157_v60, %v3156_v63  ;;  %v3159_v5 = vpop.f32.mrb[26].mxu0  ;;  %3417 = vmatmul.mubr.bf16.gmra.mrb[8].mxu1 %v1539_v56  ;;  %v1924_v63 = vadd.s32 %v4606_v62, %v1907_v0  ;;  %vm1939_vm0 = vcmp.lt.s32.totalorder %v1923_v57, 200  ;;  %vm1937_vm1 = vcmp.lt.s32.totalorder %v1921_v59, 200 }
 0x3df   : > { %v3160_v52 = vpop.f32.mrb[27].mxu0 }
 0x3e0   : > { %v3161_v53 = vadd.f32 %v3160_v52, %v3159_v5  ;;  %v1530_v55 = vmul.f32 %v3158_v4, %v1501_v54  ;;  %v1922_v4 = vadd.s32 %v4606_v62, %v1905_v2  ;;  %vm1940_vm2 = vcmp.lt.s32.totalorder %v1924_v63, 200 }
 0x3e2   : > { %v1531_v58 = vmul.f32 %v3161_v53, %v1506_v42  ;;  %vm1938_vm3 = vcmp.lt.s32.totalorder %v1922_v4, 200 }
 0x3e4   : > { %v3162_v1 = vpop.f32.mrb[28].mxu0  ;;  %v1540_v10 = vpack.c.bf16 %v1531_v58, %v1530_v55 }
 0x3e5   : > { %v3163_v11 = vpop.f32.mrb[29].mxu0 }
 0x3e6   : > { %v3164_v40 = vadd.f32 %v3163_v11, %v3162_v1  ;;  %v3165_v46 = vpop.f32.mrb[30].mxu0  ;;  %3420 = vmatprep.mubr.bf16.mxu1 %v1540_v10 }
 0x3e7   : > { %v3166_v44 = vpop.f32.mrb[31].mxu0 }
 0x3e8   : > { %v3167_v41 = vadd.f32 %v3166_v44, %v3165_v46  ;;  %v1532_v45 = vmul.f32 %v3164_v40, %v1511_v43  ;;  %v1908_v43 = vadd.s32 32, %v4602_v51 }
 0x3ea   : > { %v1533_v48 = vmul.f32 %v3167_v41, %v1516_v47  ;;  %v1910_v41 = vadd.s32 48, %v4602_v51  ;;  %v1911_v47 = vadd.s32 56, %v4602_v51 }
 0x3ec   : > { %v1541_v49 = vpack.c.bf16 %v1533_v48, %v1532_v45  ;;  %v1909_v45 = vadd.s32 40, %v4602_v51  ;;  %v1927_v48 = vadd.s32 %v4606_v62, %v1910_v41  ;;  %v1928_v26 = vadd.s32 %v4606_v62, %v1911_v47 }
 0x3ed   : > { %v1915_v41 = vadd.s32 88, %v4602_v51 }
 0x3ee   : > { %3421 = vmatmul.mubr.bf16.gmra.mrb[12].mxu1 %v1541_v49  ;;  %v1925_v49 = vadd.s32 %v4606_v62, %v1908_v43  ;;  %v1926_v57 = vadd.s32 %v4606_v62, %v1909_v45  ;;  %vm1943_vm4 = vcmp.lt.s32.totalorder %v1927_v48, 200  ;;  %vm1944_vm6 = vcmp.lt.s32.totalorder %v1928_v26, 200 }
 0x3ef   : > { %v1913_v43 = vadd.s32 72, %v4602_v51 }
 0x3f0   : > { %vm1941_vm5 = vcmp.lt.s32.totalorder %v1925_v49, 200  ;;  %vm1942_vm7 = vcmp.lt.s32.totalorder %v1926_v57, 200  ;;  %v1932_v49 = vadd.s32 %v4606_v62, %v1915_v41  ;;  %v1918_v41 = vadd.s32 112, %v4602_v51 }
 0x3f2   : > { %vm1948_vm10 = vcmp.lt.s32.totalorder %v1932_v49, 200 }
 0x491   : > { %v3410_v61 = vpop.f32.mrb[0].mxu1 }
 0x492   : > { %v1873_v56 = vadd.f32 %v3410_v61, %v4611_v3  ;;  %v1801_v60 = vpop.f32.mrb[1].mxu1 }
 0x493   : > { %v1871_v5 = vadd.f32 %v4611_v3, %v1801_v60  ;;  %v3411_v52 = vpop.f32.mrb[2].mxu1 }
 0x494   : > { %v1889_v53 = vmax.f32 %v1873_v56, 0.0  ;;  %v1874_v54 = vadd.f32 %v3411_v52, %v4611_v3  ;;  %v1804_v42 = vpop.f32.mrb[3].mxu1 }
 0x495   : > { %v1887_v55 = vmax.f32 %v1871_v5, 0.0  ;;  %v1872_v58 = vadd.f32 %v4611_v3, %v1804_v42 }
 0x496   : > { %v4622_v1 = vsel %vm1939_vm0, %v1889_v53, 0.0  ;;  %v1890_v10 = vmax.f32 %v1874_v54, 0.0 }
 0x497   : > { %v4624_v11 = vsel %vm1937_vm1, %v1887_v55, 0.0  ;;  %v1888_v40 = vmax.f32 %v1872_v58, 0.0 }
 0x498   : > { %v4626_v46 = vsel %vm1940_vm2, %v1890_v10, 0.0  ;;  %v1914_v10 = vadd.s32 80, %v4602_v51 }
 0x499   : > { %v4628_v44 = vsel %vm1938_vm3, %v1888_v40, 0.0  ;;  %v1912_v40 = vadd.s32 64, %v4602_v51 }
 0x49a   : > { %v1931_v47 = vadd.s32 %v4606_v62, %v1914_v10 }
 0x49b   : > { %v1929_v45 = vadd.s32 %v4606_v62, %v1912_v40 }
 0x49c   : > { %vm1947_vm8 = vcmp.lt.s32.totalorder %v1931_v47, 200  ;;  %v1919_v47 = vadd.s32 120, %v4602_v51 }
 0x49d   : > { %vm1945_vm9 = vcmp.lt.s32.totalorder %v1929_v45, 200  ;;  %v1917_v45 = vadd.s32 104, %v4602_v51 }
 0x4a1   : > { %v3414_v50 = vpop.f32.mrb[4].mxu1 }
 0x4a2   : > { %v1877_v0 = vadd.f32 %v3414_v50, %v4611_v3  ;;  %v1817_v2 = vpop.f32.mrb[5].mxu1 }
 0x4a3   : > { %v1875_v59 = vadd.f32 %v4611_v3, %v1817_v2  ;;  %v3415_v61 = vpop.f32.mrb[6].mxu1 }
 0x4a4   : > { %v1893_v63 = vmax.f32 %v1877_v0, 0.0  ;;  %v1878_v56 = vadd.f32 %v3415_v61, %v4611_v3  ;;  %v1820_v60 = vpop.f32.mrb[7].mxu1  ;;  %v1930_v0 = vadd.s32 %v4606_v62, %v1913_v43  ;;  %v1916_v43 = vadd.s32 96, %v4602_v51 }
 0x4a5   : > { %v1891_v4 = vmax.f32 %v1875_v59, 0.0  ;;  %v1876_v5 = vadd.f32 %v4611_v3, %v1820_v60 }
 0x4a6   : > { %v4642_v52 = vsel %vm1943_vm4, %v1893_v63, 0.0  ;;  %v1894_v53 = vmax.f32 %v1878_v56, 0.0  ;;  %vm1946_vm11 = vcmp.lt.s32.totalorder %v1930_v0, 200  ;;  %v1933_v49 = vadd.s32 %v4606_v62, %v1916_v43 }
 0x4a7   : > { %v4644_v54 = vsel %vm1941_vm5, %v1891_v4, 0.0  ;;  %v1892_v42 = vmax.f32 %v1876_v5, 0.0 }
 0x4a8   : > { %v4646_v55 = vsel %vm1944_vm6, %v1894_v53, 0.0  ;;  %vm1949_vm13 = vcmp.lt.s32.totalorder %v1933_v49, 200 }
 0x4a9   : > { %v4648_v58 = vsel %vm1942_vm7, %v1892_v42, 0.0  ;;  %v1976_v49 = vpack.c.bf16 (!%p2960_p10), %v4646_v55, %v4642_v52 }
 0x4ab   : > { %2965 = vst [vmem:[%s4554_s19 + $0x98] sm:$0xff] (!%p2960_p10), %v1976_v49 }
 0x4b1   : > { %v3418_v48 = vpop.f32.mrb[8].mxu1 }
 0x4b2   : > { %v1881_v50 = vadd.f32 %v3418_v48, %v4611_v3  ;;  %v1833_v26 = vpop.f32.mrb[9].mxu1  ;;  %v1935_v48 = vadd.s32 %v4606_v62, %v1918_v41 }
 0x4b3   : > { %v1879_v2 = vadd.f32 %v4611_v3, %v1833_v26  ;;  %v3419_v57 = vpop.f32.mrb[10].mxu1  ;;  %v1936_v26 = vadd.s32 %v4606_v62, %v1919_v47 }
 0x4b4   : > { %v1897_v59 = vmax.f32 %v1881_v50, 0.0  ;;  %v1882_v61 = vadd.f32 %v3419_v57, %v4611_v3  ;;  %v1836_v63 = vpop.f32.mrb[11].mxu1  ;;  %v1934_v57 = vadd.s32 %v4606_v62, %v1917_v45  ;;  %vm1951_vm12 = vcmp.lt.s32.totalorder %v1935_v48, 200 }
 0x4b5   : > { %v1895_v56 = vmax.f32 %v1879_v2, 0.0  ;;  %v1880_v60 = vadd.f32 %v4611_v3, %v1836_v63  ;;  %vm1952_vm14 = vcmp.lt.s32.totalorder %v1936_v26, 200  ;;  %v1974_v45 = vpack.c.bf16 (!%p2960_p10), %v4626_v46, %v4622_v1 }
 0x4b6   : > { %v4662_v4 = vsel %vm1947_vm8, %v1897_v59, 0.0  ;;  %v1898_v5 = vmax.f32 %v1882_v61, 0.0  ;;  %vm1950_vm15 = vcmp.lt.s32.totalorder %v1934_v57, 200  ;;  %v1975_v48 = vpack.c.bf16 (!%p2960_p10), %v4648_v58, %v4644_v54 }
 0x4b7   : > { %v1961_v53 = vsel %vm1945_vm9, %v1895_v56, 0.0  ;;  %v1896_v42 = vmax.f32 %v1880_v60, 0.0  ;;  %2963 = vst [vmem:[%s4554_s19 + $0x88] sm:$0xff] (!%p2960_p10), %v1974_v45 }
 0x4b8   : > { %v1964_v10 = vsel %vm1948_vm10, %v1898_v5, 0.0  ;;  %2964 = vst [vmem:[%s4554_s19 + $0x90] sm:$0xff] (!%p2960_p10), %v1975_v48 }
 0x4b9   : > { %v1962_v40 = vsel %vm1946_vm11, %v1896_v42, 0.0 }
 0x4ba   : > { %v1977_v26 = vpack.c.bf16 (!%p2960_p10), %v1962_v40, %v1961_v53 }
 0x4bc   : > { %2966 = vst [vmem:[%s4554_s19 + $0xa0] sm:$0xff] (!%p2960_p10), %v1977_v26 }
 0x4c1   : > { %v3422_v50 = vpop.f32.mrb[12].mxu1 }
 0x4c2   : > { %v1885_v0 = vadd.f32 %v3422_v50, %v4611_v3  ;;  %v1849_v2 = vpop.f32.mrb[13].mxu1 }
 0x4c3   : > { %v1883_v59 = vadd.f32 %v4611_v3, %v1849_v2  ;;  %v3423_v61 = vpop.f32.mrb[14].mxu1  ;;  %1972 = sbr.rel (%p2960_p10) target bundleno = 1229 (0x4cd), region = 76 }
 0x4c4   : > { %v1901_v63 = vmax.f32 %v1885_v0, 0.0  ;;  %v1886_v51 = vadd.f32 %v3423_v61, %v4611_v3  ;;  %v1852_v56 = vpop.f32.mrb[15].mxu1  ;;  %v1978_v0 = vpack.c.bf16 (!%p2960_p10), %v1964_v10, %v4662_v4 }
 0x4c5   : > { %v1899_v60 = vmax.f32 %v1883_v59, 0.0  ;;  %v1884_v5 = vadd.f32 %v4611_v3, %v1852_v56  ;;  %v1973_v3 = vpack.c.bf16 (!%p2960_p10), %v4628_v44, %v4624_v11 }
 0x4c6   : > { %v1967_v42 = vsel %vm1951_vm12, %v1901_v63, 0.0  ;;  %v1902_v41 = vmax.f32 %v1886_v51, 0.0  ;;  %2967 = vst [vmem:[%s4554_s19 + $0xa8] sm:$0xff] (!%p2960_p10), %v1978_v0 }
 0x4c7   : > { %v1965_v43 = vsel %vm1949_vm13, %v1899_v60, 0.0  ;;  %v1900_v47 = vmax.f32 %v1884_v5, 0.0  ;;  %2962 = vst [vmem:[%s4554_s19 + $0x80] sm:$0xff] (!%p2960_p10), %v1973_v3 }
 0x4c8   : > { %v1968_v50 = vsel %vm1952_vm14, %v1902_v41, 0.0 }
 0x4c9   : > { %v1966_v62 = vsel %vm1950_vm15, %v1900_v47, 0.0  ;;  %v1980_v57 = vpack.c.bf16 (!%p2960_p10), %v1968_v50, %v1967_v42 }
 0x4ca   : > { %v1979_v2 = vpack.c.bf16 %v1966_v62, %v1965_v43 }
 0x4cb   : > { %2969 = vst [vmem:[%s4554_s19 + $0xb8] sm:$0xff] %v1980_v57 }
 0x4cc   : > { %2968 = vst [vmem:[%s4554_s19 + $0xb0] sm:$0xff] %v1979_v2 }
 0x4cd PF: > { %p2970_p0 = scmp.ne.s32.totalorder %s3945_s28, 2 }
 0x4ce   : > { %s1996_s14 = scalar_lea.vmem (!%p2970_p0), [#allocation9], %s4264_s16 }
 0x4cf   : > { %1995 = sbr.rel (%p2970_p0) target bundleno = 1239 (0x4d7), region = 80  ;;  %1997 = vst [vmem:[%s1996_s14] sm:$0xff] (!%p2970_p0), %v4624_v11  ;;  %1998 = vst [vmem:[%s1996_s14 + $0x8] sm:$0xff] (!%p2970_p0), %v4628_v44 }
 0x4d0   : > { %1999 = vst [vmem:[%s1996_s14 + $0x10] sm:$0xff] (!%p2970_p0), %v4622_v1  ;;  %2000 = vst [vmem:[%s1996_s14 + $0x18] sm:$0xff] (!%p2970_p0), %v4626_v46 }
 0x4d1   : > { %2001 = vst [vmem:[%s1996_s14 + $0x20] sm:$0xff] (!%p2970_p0), %v4644_v54  ;;  %2002 = vst [vmem:[%s1996_s14 + $0x28] sm:$0xff] (!%p2970_p0), %v4648_v58 }
 0x4d2   : > { %2003 = vst [vmem:[%s1996_s14 + $0x30] sm:$0xff] (!%p2970_p0), %v4642_v52  ;;  %2004 = vst [vmem:[%s1996_s14 + $0x38] sm:$0xff] (!%p2970_p0), %v4646_v55 }
 0x4d3   : > { %2005 = vst [vmem:[%s1996_s14 + $0x40] sm:$0xff] (!%p2970_p0), %v1961_v53  ;;  %2006 = vst [vmem:[%s1996_s14 + $0x48] sm:$0xff] (!%p2970_p0), %v1962_v40 }
 0x4d4   : > { %2007 = vst [vmem:[%s1996_s14 + $0x50] sm:$0xff] (!%p2970_p0), %v4662_v4  ;;  %2008 = vst [vmem:[%s1996_s14 + $0x58] sm:$0xff] (!%p2970_p0), %v1964_v10 }
 0x4d5   : > { %2009 = vst [vmem:[%s1996_s14 + $0x60] sm:$0xff] (!%p2970_p0), %v1965_v43  ;;  %2010 = vst [vmem:[%s1996_s14 + $0x68] sm:$0xff] (!%p2970_p0), %v1966_v62 }
 0x4d6   : > { %2011 = vst [vmem:[%s1996_s14 + $0x70] sm:$0xff] %v1967_v42  ;;  %2012 = vst [vmem:[%s1996_s14 + $0x78] sm:$0xff] %v1968_v50 }
 0x4d7 PF: > { %p2013_p12 = scmp.eq.s32.totalorder %s4994_s13, 0 }
 0x4d9   : > { %p2014_p4 = pnand %p2013_p12, %p1295_p3 }
 0x4da   : > { %v2027_v1 = vld [vmem:[#allocation2 + $0xc0] sm:$0xff] (!%p2014_p4)  ;;  %v2028_v46 = vld [vmem:[#allocation2 + $0xc8] sm:$0xff] (!%p2014_p4)  ;;  %2080 = vmatprep.mubr.bf16.mxu0 (!%p2014_p4), %v4290_v7  ;;  %v3968_v44 = vmov (!%p2014_p4), 0   ;;  %v2029_v54 = vld [vmem:[#allocation2 + $0xd0] sm:$0xff] (!%p2014_p4)  ;;  %s2035_s9 = sshra.s32 (!%p2014_p4), %s4264_s16, 4  ;;  %p2997_p1 = scmp.ge.s32.totalorder (!%p2014_p4), %s3945_s28, 2 }
 0x4db   : > { %2017 = sbr.rel (%p2014_p4) target bundleno = 1785 (0x6f9), region = 84  ;;  %v2019_v11 = vld [vmem:[#allocation2 + $0x80] sm:$0xff] (!%p2014_p4)  ;;  %3200 = vmatprep.subr.bf16.mxu0 (!%p2014_p4), %v2027_v1  ;;  %3723 = vset.pattern.permute.xlu0 (!%p2014_p4), %v3968_v44  ;;  %v2020_v52 = vld [vmem:[#allocation2 + $0x88] sm:$0xff] (!%p2014_p4)  ;;  %v2021_v55 = vld [vmem:[#allocation2 + $0x90] sm:$0xff] (!%p2014_p4)  ;;  %s2971_s20 = sshll.u32 (!%p2014_p4), %s2035_s9, 3 }
 0x4dc   : > { %3201 = vmatpush3.bf16.msra.mxu0 (!%p2014_p4), %v2019_v11  ;;  %2147 = vperm.xlu0 (!%p2014_p4), %3723, %v4307_v16   ;;  %v3725_v7 = vld [vmem:[%s4255_s12] sm:$0xff] (!%p2014_p4)   ;;  %v3726_v58 = vld [vmem:[%s4255_s12 + $0x8] sm:$0xff] (!%p2014_p4)   ;;  %v2030_v4 = vld [vmem:[#allocation2 + $0xd8] sm:$0xff] (!%p2014_p4)  ;;  %s4719_s0 = scalar_lea.vmem (!%p2014_p4), [#allocation2], %s2971_s20 }
 0x4dd   : > { %3202 = vmatprep.subr.bf16.mxu0 (!%p2014_p4), %v2028_v46  ;;  %3724 = vset.pattern.permute.xlu1 (!%p2014_p4), %v3968_v44  ;;  %v2022_v16 = vld [vmem:[#allocation2 + $0x98] sm:$0xff] (!%p2014_p4)  ;;  %v2031_v53 = vld [vmem:[#allocation2 + $0xe0] sm:$0xff] (!%p2014_p4)  ;;  %v2024_v40 = vld [vmem:[#allocation2 + $0xa8] sm:$0xff] (!%p2014_p4) }
 0x4de   : > { %2157 = vperm.xlu1 (!%p2014_p4), %3724, %v4321_v22   ;;  %3424 = vmatprep.subr.bf16.mxu1 (!%p2014_p4), %v3725_v7  ;;  %v3727_v22 = vld [vmem:[%s4255_s12 + $0x10] sm:$0xff] (!%p2014_p4)   ;;  %v3728_v10 = vld [vmem:[%s4255_s12 + $0x18] sm:$0xff] (!%p2014_p4)   ;;  %v3729_v59 = vld [vmem:[%s4255_s12 + $0x20] sm:$0xff] (!%p2014_p4)  }
 0x4df   : > { %3425 = vmatpush3.bf16.msra.mxu1 (!%p2014_p4), %v3725_v7  ;;  %v2034_v61 = vld [vmem:[#allocation2 + $0xf8] sm:$0xff] (!%p2014_p4) }
 0x4e0   : > { %3203 = vmatpush3.bf16.msra.mxu0 (!%p2014_p4), %v2020_v52  ;;  %2152 = vperm.xlu0 (!%p2014_p4), %3723, %v4318_v21   ;;  %v2972_v21 = vld [vmem:[%s4719_s0 + $0x80] sm:$0xff] (!%p2014_p4) }
 0x4e1   : > { %3204 = vmatprep.subr.bf16.mxu0 (!%p2014_p4), %v2029_v54  ;;  %3426 = vmatprep.subr.bf16.mxu1 (!%p2014_p4), %v3726_v58 }
 0x4e2   : > { %2162 = vperm.xlu1 %3724, %v4324_v23   ;;  %v2023_v23 = vld [vmem:[#allocation2 + $0xa0] sm:$0xff]  ;;  %3440 = vmatprep.mubr.bf16.mxu1 %v2972_v21 }
 0x4e3   : > { %3427 = vmatpush3.bf16.msra.mxu1 %v3726_v58 }
 0x4e4   : > { %3205 = vmatpush3.bf16.msra.mxu0 %v2021_v55  ;;  %2167 = vperm.xlu0 %3723, %v4335_v28   ;;  %v2032_v28 = vld [vmem:[#allocation2 + $0xe8] sm:$0xff] }
 0x4e5   : > { %3206 = vmatprep.subr.bf16.mxu0 %v2030_v4  ;;  %3428 = vmatprep.subr.bf16.mxu1 %v3727_v22 }
 0x4e6   : > { %2172 = vperm.xlu1 %3724, %v4338_v29   ;;  %v2033_v29 = vld [vmem:[#allocation2 + $0xf0] sm:$0xff] }
 0x4e7   : > { %3429 = vmatpush3.bf16.msra.mxu1 %v3727_v22 }
 0x4e8   : > { %3207 = vmatpush3.bf16.msra.mxu0 %v2022_v16  ;;  %2177 = vperm.xlu0 %3723, %v4341_v30   ;;  %v2025_v30 = vld [vmem:[#allocation2 + $0xb0] sm:$0xff] }
 0x4e9   : > { %3208 = vmatprep.subr.bf16.mxu0 %v2031_v53  ;;  %3430 = vmatprep.subr.bf16.mxu1 %v3728_v10 }
 0x4ea   : > { %2182 = vperm.xlu1 %3724, %v4344_v31   ;;  %v3730_v31 = vld [vmem:[%s4255_s12 + $0x28] sm:$0xff]  }
 0x4eb   : > { %3431 = vmatpush3.bf16.msra.mxu1 %v3728_v10 }
 0x4ec   : > { %3209 = vmatpush3.bf16.msra.mxu0 %v2023_v23  ;;  %2187 = vperm.xlu0 %3723, %v4347_v32   ;;  %v2026_v32 = vld [vmem:[#allocation2 + $0xb8] sm:$0xff] }
 0x4ed   : > { %3210 = vmatprep.subr.bf16.mxu0 %v2032_v28  ;;  %3432 = vmatprep.subr.bf16.mxu1 %v3729_v59 }
 0x4ee   : > { %2192 = vperm.xlu1 %3724, %v4350_v33   ;;  %v3731_v33 = vld [vmem:[%s4255_s12 + $0x30] sm:$0xff]  }
 0x4ef   : > { %3433 = vmatpush3.bf16.msra.mxu1 %v3729_v59 }
 0x4f0   : > { %3211 = vmatpush3.bf16.msra.mxu0 %v2024_v40  ;;  %2197 = vperm.xlu0 %3723, %v4353_v34   ;;  %v3732_v34 = vld [vmem:[%s4255_s12 + $0x38] sm:$0xff]  }
 0x4f1   : > { %3212 = vmatprep.subr.bf16.mxu0 %v2033_v29  ;;  %3434 = vmatprep.subr.bf16.mxu1 %v3730_v31 }
 0x4f2   : > { %2202 = vperm.xlu1 %3724, %v4356_v35   ;;  %v3733_v35 = vld [vmem:[%s4275_s10] sm:$0xff]  }
 0x4f3   : > { %3435 = vmatpush3.bf16.msra.mxu1 %v3730_v31 }
 0x4f4   : > { %3213 = vmatpush3.bf16.msra.mxu0 %v2025_v30  ;;  %2207 = vperm.xlu0 %3723, %v4359_v36   ;;  %v2973_v36 = vld [vmem:[%s4719_s0 + $0x88] sm:$0xff] }
 0x4f5   : > { %3214 = vmatprep.subr.bf16.mxu0 %v2034_v61  ;;  %3436 = vmatprep.subr.bf16.mxu1 %v3731_v33 }
 0x4f6   : > { %2212 = vperm.xlu1 %3724, %v4362_v37   ;;  %v3734_v37 = vld [vmem:[%s4275_s10 + $0x8] sm:$0xff]  }
 0x4f7   : > { %3437 = vmatpush3.bf16.msra.mxu1 %v3731_v33 }
 0x4f8   : > { %3215 = vmatpush3.bf16.msra.mxu0 %v2026_v32  ;;  %2217 = vperm.xlu0 %3723, %v4365_v38   ;;  %v2974_v38 = vld [vmem:[%s4719_s0 + $0x90] sm:$0xff] }
 0x4f9   : > { %3438 = vmatprep.subr.bf16.mxu1 %v3732_v34 }
 0x4fa   : > { %2222 = vperm.xlu1 %3724, %v4368_v39   ;;  %v3736_v39 = vld [vmem:[%s4275_s10 + $0x18] sm:$0xff]  }
 0x4fb   : > { %2081 = vmatmul.mubr.bf16.vlgmr.msra.gmra.mrb[0].mxu0 %v4288_v6  ;;  %3439 = vmatpush3.bf16.msra.mxu1 %v3732_v34  ;;  %v3735_v6 = vld [vmem:[%s4275_s10 + $0x10] sm:$0xff]  }
 0x4fc   : > { %2088 = vmatprep.mubr.bf16.mxu0 %v4294_v9  ;;  %3456 = vmatprep.subr.bf16.mxu1 %v3733_v35  ;;  %v2975_v9 = vld [vmem:[%s4719_s0 + $0x98] sm:$0xff] }
 0x4fe   : > { %3441 = vmatmul.mubr.bf16.vlgmr.msra.gmra.mrb[0].mxu1 %v2973_v36 }
 0x4ff   : > { %3457 = vmatpush3.bf16.msra.mxu1 %v3733_v35  ;;  %3444 = vmatprep.mubr.bf16.mxu1 %v2974_v38 }
 0x500   : > { %3458 = vmatprep.subr.bf16.mxu1 %v3734_v37 }
 0x503   : > { %2089 = vmatmul.mubr.bf16.gmra.mrb[4].mxu0 %v4292_v8  ;;  %3459 = vmatpush3.bf16.msra.mxu1 %v3734_v37  ;;  %v4969_v8 = vld [vmem:[#allocation18_spill] sm:$0xff] }
 0x504   : > { %2096 = vmatprep.mubr.bf16.mxu0 %v4300_v13  ;;  %3460 = vmatprep.subr.bf16.mxu1 %v3735_v6  ;;  %v2977_v13 = vld [vmem:[%s4719_s0 + $0xa8] sm:$0xff] }
 0x506   : > { %3445 = vmatmul.mubr.bf16.gmra.mrb[4].mxu1 %v2975_v9 }
 0x507   : > { %3461 = vmatpush3.bf16.msra.mxu1 %v3735_v6 }
 0x508   : > { %3462 = vmatprep.subr.bf16.mxu1 %v3736_v39 }
 0x50b   : > { %2097 = vmatmul.mubr.bf16.gmra.mrb[8].mxu0 %v4298_v12  ;;  %3463 = vmatpush3.bf16.msra.mxu1 %v3736_v39  ;;  %v2976_v12 = vld [vmem:[%s4719_s0 + $0xa0] sm:$0xff] }
 0x50c   : > { %2104 = vmatprep.mubr.bf16.mxu0 %v4304_v15  ;;  %3448 = vmatprep.mubr.bf16.mxu1 %v2976_v12  ;;  %v3738_v15 = vld [vmem:[%s4275_s10 + $0x28] sm:$0xff]  }
 0x50e   : > { %3449 = vmatmul.mubr.bf16.gmra.mrb[8].mxu1 %v2977_v13 }
 0x513   : > { %2105 = vmatmul.mubr.bf16.gmra.mrb[12].mxu0 %v4302_v14  ;;  %v3737_v14 = vld [vmem:[%s4275_s10 + $0x20] sm:$0xff]  }
 0x514   : > { %2112 = vmatprep.mubr.bf16.mxu0 %v4311_v18  ;;  %3464 = vmatprep.subr.bf16.mxu1 %v3737_v14  ;;  %v2979_v18 = vld [vmem:[%s4719_s0 + $0xb8] sm:$0xff] }
 0x515   : > { %3465 = vmatpush3.bf16.msra.mxu1 %v3737_v14 }
 0x516   : > { %3466 = vmatprep.subr.bf16.mxu1 %v3738_v15 }
 0x519   : > { %3467 = vmatpush3.bf16.msra.mxu1 %v3738_v15 }
 0x51b   : > { %2113 = vmatmul.mubr.bf16.gmra.mrb[16].mxu0 %v4309_v17  ;;  %v2978_v17 = vld [vmem:[%s4719_s0 + $0xb0] sm:$0xff] }
 0x51c   : > { %2120 = vmatprep.mubr.bf16.mxu0 %v4315_v20  ;;  %3452 = vmatprep.mubr.bf16.mxu1 %v2978_v17  ;;  %v3740_v20 = vld [vmem:[%s4275_s10 + $0x38] sm:$0xff]  }
 0x51d   : > { %3453 = vmatmul.mubr.bf16.gmra.mrb[12].mxu1 %v2979_v18 }
 0x523   : > { %2121 = vmatmul.mubr.bf16.gmra.mrb[20].mxu0 %v4313_v19  ;;  %v3739_v19 = vld [vmem:[%s4275_s10 + $0x30] sm:$0xff]  }
 0x524   : > { %2128 = vmatprep.mubr.bf16.mxu0 %v4328_v25  ;;  %3468 = vmatprep.subr.bf16.mxu1 %v3739_v19 }
 0x525   : > { %3469 = vmatpush3.bf16.msra.mxu1 %v3739_v19 }
 0x526   : > { %3470 = vmatprep.subr.bf16.mxu1 %v3740_v20 }
 0x529   : > { %3471 = vmatpush3.bf16.msra.mxu1 %v3740_v20 }
 0x52b   : > { %2129 = vmatmul.mubr.bf16.gmra.mrb[24].mxu0 %v4326_v24 }
 0x52c   : > { %2136 = vmatprep.mubr.bf16.mxu0 %v4332_v27 }
 0x533   : > { %2137 = vmatmul.mubr.bf16.gmra.mrb[28].mxu0 %v4969_v8 }
 0x55b   : > { %v2148_v24 = vpop.permute.xlu0 %2147 }
 0x55d   : > { %v2158_v43 = vpop.permute.xlu1 %2157 }
 0x55f   : > { %v2153_v60 = vpop.permute.xlu0 %2152 }
 0x561   : > { %v2163_v26 = vpop.permute.xlu1 %2162 }
 0x563   : > { %v2168_v55 = vpop.permute.xlu0 %2167 }
 0x565   : > { %v2173_v7 = vpop.permute.xlu1 %2172 }
 0x567   : > { %v2178_v40 = vpop.permute.xlu0 %2177 }
 0x569   : > { %v2183_v29 = vpop.permute.xlu1 %2182 }
 0x56b   : > { %v2188_v37 = vpop.permute.xlu0 %2187 }
 0x56d   : > { %v2193_v38 = vpop.permute.xlu1 %2192 }
 0x56f   : > { %v2198_v18 = vpop.permute.xlu0 %2197 }
 0x571   : > { %v2203_v19 = vpop.permute.xlu1 %2202 }
 0x5ce   : > { %v3216_v25 = vpop.f32.mrb[0].mxu0 }
 0x5cf   : > { %v3217_v27 = vpop.f32.mrb[1].mxu0 }
 0x5d0   : > { %v3218_v63 = vadd.f32 %v3217_v27, %v3216_v25  ;;  %v3219_v51 = vpop.f32.mrb[2].mxu0 }
 0x5d1   : > { %v3220_v56 = vpop.f32.mrb[3].mxu0 }
 0x5d2   : > { %v3221_v5 = vadd.f32 %v3220_v56, %v3219_v51  ;;  %v2225_v42 = vmul.f32 %v3218_v63, %v2148_v24 }
 0x5d4   : > { %v2226_v41 = vmul.f32 %v3221_v5, %v2153_v60 }
 0x5d6   : > { %v2241_v47 = vpack.c.bf16 %v2226_v41, %v2225_v42  ;;  %v3222_v50 = vpop.f32.mrb[4].mxu0  ;;  %v2208_v42 = vpop.permute.xlu0 %2207 }
 0x5d7   : > { %v3223_v62 = vpop.f32.mrb[5].mxu0  ;;  %v2213_v41 = vpop.permute.xlu1 %2212 }
 0x5d8   : > { %v3224_v3 = vadd.f32 %v3223_v62, %v3222_v50  ;;  %v3225_v45 = vpop.f32.mrb[6].mxu0  ;;  %3472 = vmatprep.mubr.bf16.mxu1 %v2241_v47 }
 0x5d9   : > { %v3226_v48 = vpop.f32.mrb[7].mxu0 }
 0x5da   : > { %v3227_v49 = vadd.f32 %v3226_v48, %v3225_v45  ;;  %v2227_v0 = vmul.f32 %v3224_v3, %v2158_v43 }
 0x5dc   : > { %v2228_v2 = vmul.f32 %v3227_v49, %v2163_v26 }
 0x5de   : > { %v2242_v57 = vpack.c.bf16 %v2228_v2, %v2227_v0  ;;  %v3228_v1 = vpop.f32.mrb[8].mxu0  ;;  %v2218_v0 = vpop.permute.xlu0 %2217 }
 0x5df   : > { %v3229_v11 = vpop.f32.mrb[9].mxu0  ;;  %v2223_v2 = vpop.permute.xlu1 %2222 }
 0x5e0   : > { %v3230_v46 = vadd.f32 %v3229_v11, %v3228_v1  ;;  %v3231_v44 = vpop.f32.mrb[10].mxu0  ;;  %3473 = vmatmul.mubr.bf16.vlgmr.msra.gmra.mrb[0].mxu1 %v2242_v57 }
 0x5e1   : > { %v3232_v52 = vpop.f32.mrb[11].mxu0 }
 0x5e2   : > { %v3233_v54 = vadd.f32 %v3232_v52, %v3231_v44  ;;  %v2229_v58 = vmul.f32 %v3230_v46, %v2168_v55  ;;  %v2610_v46 = vlaneseq }
 0x5e4   : > { %v2230_v4 = vmul.f32 %v3233_v54, %v2173_v7  ;;  %v4767_v44 = vshrl.u32 %v2610_v46, 7  ;;  %v4771_v54 = vstv %s4264_s16 }
 0x5e6   : > { %v3234_v16 = vpop.f32.mrb[12].mxu0  ;;  %v2243_v22 = vpack.c.bf16 %v2230_v4, %v2229_v58  ;;  %v2613_v52 = vadd.s32 16, %v4767_v44  ;;  %v2614_v55 = vadd.s32 24, %v4767_v44  ;;  %v2612_v7 = vadd.s32 8, %v4767_v44  ;;  %v4776_v58 = vld [vmem:[%s4270_s15] ss:$0 sm:$0xff] }
 0x5e7   : > { %v3235_v53 = vpop.f32.mrb[13].mxu0 }
 0x5e8   : > { %v3236_v21 = vadd.f32 %v3235_v53, %v3234_v16  ;;  %v3237_v23 = vpop.f32.mrb[14].mxu0  ;;  %3476 = vmatprep.mubr.bf16.mxu1 %v2243_v22  ;;  %v2630_v4 = vadd.s32 %v4771_v54, %v2613_v52  ;;  %v2628_v16 = vadd.s32 %v4771_v54, %v4767_v44  ;;  %v2631_v53 = vadd.s32 %v4771_v54, %v2614_v55 }
 0x5e9   : > { %v3238_v10 = vpop.f32.mrb[15].mxu0 }
 0x5ea   : > { %v3239_v28 = vadd.f32 %v3238_v10, %v3237_v23  ;;  %v2231_v59 = vmul.f32 %v3236_v21, %v2178_v40  ;;  %v2629_v10 = vadd.s32 %v4771_v54, %v2612_v7  ;;  %vm2646_vm0 = vcmp.lt.s32.totalorder %v2630_v4, 200 }
 0x5eb   : > { %vm2644_vm1 = vcmp.lt.s32.totalorder %v2628_v16, 200  ;;  %vm2647_vm2 = vcmp.lt.s32.totalorder %v2631_v53, 200 }
 0x5ec   : > { %v2232_v30 = vmul.f32 %v3239_v28, %v2183_v29  ;;  %vm2645_vm3 = vcmp.lt.s32.totalorder %v2629_v10, 200 }
 0x5ee   : > { %v3240_v31 = vpop.f32.mrb[16].mxu0  ;;  %v2244_v61 = vpack.c.bf16 %v2232_v30, %v2231_v59 }
 0x5ef   : > { %v3241_v32 = vpop.f32.mrb[17].mxu0 }
 0x5f0   : > { %v3242_v33 = vadd.f32 %v3241_v32, %v3240_v31  ;;  %v3243_v34 = vpop.f32.mrb[18].mxu0  ;;  %3477 = vmatmul.mubr.bf16.gmra.mrb[4].mxu1 %v2244_v61 }
 0x5f1   : > { %v3244_v35 = vpop.f32.mrb[19].mxu0 }
 0x5f2   : > { %v3245_v36 = vadd.f32 %v3244_v35, %v3243_v34  ;;  %v2233_v6 = vmul.f32 %v3242_v33, %v2188_v37 }
 0x5f4   : > { %v2234_v9 = vmul.f32 %v3245_v36, %v2193_v38  ;;  %v2617_v38 = vadd.s32 48, %v4767_v44 }
 0x5f6   : > { %v3246_v39 = vpop.f32.mrb[20].mxu0  ;;  %v2245_v8 = vpack.c.bf16 %v2234_v9, %v2233_v6  ;;  %v2615_v6 = vadd.s32 32, %v4767_v44  ;;  %v2618_v9 = vadd.s32 56, %v4767_v44 }
 0x5f7   : > { %v3247_v12 = vpop.f32.mrb[21].mxu0 }
 0x5f8   : > { %v3248_v13 = vadd.f32 %v3247_v12, %v3246_v39  ;;  %v3249_v14 = vpop.f32.mrb[22].mxu0  ;;  %3480 = vmatprep.mubr.bf16.mxu1 %v2245_v8  ;;  %v2616_v39 = vadd.s32 40, %v4767_v44  ;;  %v2634_v8 = vadd.s32 %v4771_v54, %v2617_v38  ;;  %v2632_v12 = vadd.s32 %v4771_v54, %v2615_v6 }
 0x5f9   : > { %v3250_v15 = vpop.f32.mrb[23].mxu0 }
 0x5fa   : > { %v3251_v17 = vadd.f32 %v3250_v15, %v3249_v14  ;;  %v2235_v20 = vmul.f32 %v3248_v13, %v2198_v18  ;;  %v2635_v14 = vadd.s32 %v4771_v54, %v2618_v9  ;;  %v2633_v18 = vadd.s32 %v4771_v54, %v2616_v39 }
 0x5fb   : > { %vm2650_vm4 = vcmp.lt.s32.totalorder %v2634_v8, 200  ;;  %vm2648_vm5 = vcmp.lt.s32.totalorder %v2632_v12, 200 }
 0x5fc   : > { %v2236_v24 = vmul.f32 %v3251_v17, %v2203_v19  ;;  %vm2651_vm6 = vcmp.lt.s32.totalorder %v2635_v14, 200  ;;  %vm2649_vm7 = vcmp.lt.s32.totalorder %v2633_v18, 200 }
 0x5fe   : > { %v3252_v25 = vpop.f32.mrb[24].mxu0  ;;  %v2246_v27 = vpack.c.bf16 %v2236_v24, %v2235_v20 }
 0x5ff   : > { %v3253_v63 = vpop.f32.mrb[25].mxu0 }
 0x600   : > { %v3254_v51 = vadd.f32 %v3253_v63, %v3252_v25  ;;  %v3255_v56 = vpop.f32.mrb[26].mxu0  ;;  %3481 = vmatmul.mubr.bf16.gmra.mrb[8].mxu1 %v2246_v27 }
 0x601   : > { %v3256_v60 = vpop.f32.mrb[27].mxu0 }
 0x602   : > { %v3257_v5 = vadd.f32 %v3256_v60, %v3255_v56  ;;  %v2237_v43 = vmul.f32 %v3254_v51, %v2208_v42 }
 0x604   : > { %v2238_v47 = vmul.f32 %v3257_v5, %v2213_v41 }
 0x606   : > { %v3258_v50 = vpop.f32.mrb[28].mxu0  ;;  %v2247_v62 = vpack.c.bf16 %v2238_v47, %v2237_v43  ;;  %v2621_v47 = vadd.s32 80, %v4767_v44 }
 0x607   : > { %v3259_v3 = vpop.f32.mrb[29].mxu0 }
 0x608   : > { %v3260_v45 = vadd.f32 %v3259_v3, %v3258_v50  ;;  %v3261_v48 = vpop.f32.mrb[30].mxu0  ;;  %3484 = vmatprep.mubr.bf16.mxu1 %v2247_v62  ;;  %v2619_v50 = vadd.s32 64, %v4767_v44  ;;  %v2622_v62 = vadd.s32 88, %v4767_v44  ;;  %v2620_v3 = vadd.s32 72, %v4767_v44 }
 0x609   : > { %v3262_v49 = vpop.f32.mrb[31].mxu0 }
 0x60a   : > { %v3263_v26 = vadd.f32 %v3262_v49, %v3261_v48  ;;  %v2239_v57 = vmul.f32 %v3260_v45, %v2218_v0  ;;  %v2638_v45 = vadd.s32 %v4771_v54, %v2621_v47  ;;  %v2636_v48 = vadd.s32 %v4771_v54, %v2619_v50 }
 0x60c   : > { %v2240_v1 = vmul.f32 %v3263_v26, %v2223_v2  ;;  %v2639_v26 = vadd.s32 %v4771_v54, %v2622_v62  ;;  %vm2654_vm8 = vcmp.lt.s32.totalorder %v2638_v45, 200  ;;  %vm2652_vm9 = vcmp.lt.s32.totalorder %v2636_v48, 200 }
 0x60e   : > { %v2248_v11 = vpack.c.bf16 %v2240_v1, %v2239_v57  ;;  %v2637_v57 = vadd.s32 %v4771_v54, %v2620_v3  ;;  %vm2655_vm10 = vcmp.lt.s32.totalorder %v2639_v26, 200 }
 0x610   : > { %3485 = vmatmul.mubr.bf16.gmra.mrb[12].mxu1 %v2248_v11  ;;  %vm2653_vm11 = vcmp.lt.s32.totalorder %v2637_v57, 200 }
 0x6b3   : > { %v3474_v22 = vpop.f32.mrb[0].mxu1 }
 0x6b4   : > { %v2580_v21 = vadd.f32 %v3474_v22, %v4776_v58  ;;  %v2508_v23 = vpop.f32.mrb[1].mxu1 }
 0x6b5   : > { %v2578_v28 = vadd.f32 %v4776_v58, %v2508_v23  ;;  %v3475_v40 = vpop.f32.mrb[2].mxu1 }
 0x6b6   : > { %v2596_v29 = vmax.f32 %v2580_v21, 0.0  ;;  %v2581_v59 = vadd.f32 %v3475_v40, %v4776_v58  ;;  %v2511_v30 = vpop.f32.mrb[3].mxu1  ;;  %v2623_v40 = vadd.s32 96, %v4767_v44 }
 0x6b7   : > { %v2594_v31 = vmax.f32 %v2578_v28, 0.0  ;;  %v2579_v61 = vadd.f32 %v4776_v58, %v2511_v30  ;;  %v2625_v28 = vadd.s32 112, %v4767_v44 }
 0x6b8   : > { %v4787_v32 = vsel %vm2646_vm0, %v2596_v29, 0.0  ;;  %v2597_v33 = vmax.f32 %v2581_v59, 0.0  ;;  %v2626_v29 = vadd.s32 120, %v4767_v44  ;;  %v2624_v59 = vadd.s32 104, %v4767_v44 }
 0x6b9   : > { %v4789_v34 = vsel %vm2644_vm1, %v2594_v31, 0.0  ;;  %v2595_v35 = vmax.f32 %v2579_v61, 0.0  ;;  %v2642_v30 = vadd.s32 %v4771_v54, %v2625_v28  ;;  %v2640_v31 = vadd.s32 %v4771_v54, %v2623_v40 }
 0x6ba   : > { %v4791_v36 = vsel %vm2647_vm2, %v2597_v33, 0.0  ;;  %v2643_v33 = vadd.s32 %v4771_v54, %v2626_v29  ;;  %v2641_v6 = vadd.s32 %v4771_v54, %v2624_v59 }
 0x6bb   : > { %v4793_v37 = vsel %vm2645_vm3, %v2595_v35, 0.0  ;;  %vm2658_vm12 = vcmp.lt.s32.totalorder %v2642_v30, 200  ;;  %vm2656_vm13 = vcmp.lt.s32.totalorder %v2640_v31, 200 }
 0x6bc   : > { %vm2659_vm14 = vcmp.lt.s32.totalorder %v2643_v33, 200  ;;  %vm2657_vm15 = vcmp.lt.s32.totalorder %v2641_v6, 200 }
 0x6c3   : > { %v3478_v13 = vpop.f32.mrb[4].mxu1 }
 0x6c4   : > { %v2584_v15 = vadd.f32 %v3478_v13, %v4776_v58  ;;  %v2524_v17 = vpop.f32.mrb[5].mxu1 }
 0x6c5   : > { %v2582_v19 = vadd.f32 %v4776_v58, %v2524_v17  ;;  %v3479_v20 = vpop.f32.mrb[6].mxu1 }
 0x6c6   : > { %v2600_v24 = vmax.f32 %v2584_v15, 0.0  ;;  %v2585_v25 = vadd.f32 %v3479_v20, %v4776_v58  ;;  %v2527_v27 = vpop.f32.mrb[7].mxu1 }
 0x6c7   : > { %v2598_v63 = vmax.f32 %v2582_v19, 0.0  ;;  %v2583_v51 = vadd.f32 %v4776_v58, %v2527_v27 }
 0x6c8   : > { %v4807_v56 = vsel %vm2650_vm4, %v2600_v24, 0.0  ;;  %v2601_v60 = vmax.f32 %v2585_v25, 0.0  ;;  %v2681_v24 = vpack.c.bf16 (!%p2997_p1), %v4791_v36, %v4787_v32 }
 0x6c9   : > { %v4809_v5 = vsel %vm2648_vm5, %v2598_v63, 0.0  ;;  %v2599_v42 = vmax.f32 %v2583_v51, 0.0 }
 0x6ca   : > { %v4811_v41 = vsel %vm2651_vm6, %v2601_v60, 0.0  ;;  %2691 = vst [vmem:[%s4719_s0 + $0x8] sm:$0xff] (!%p2997_p1), %v2681_v24 }
 0x6cb   : > { %v4813_v43 = vsel %vm2649_vm7, %v2599_v42, 0.0  ;;  %v2683_v27 = vpack.c.bf16 (!%p2997_p1), %v4811_v41, %v4807_v56 }
 0x6cc   : > { %v2682_v25 = vpack.c.bf16 (!%p2997_p1), %v4813_v43, %v4809_v5 }
 0x6cd   : > { %2693 = vst [vmem:[%s4719_s0 + $0x18] sm:$0xff] (!%p2997_p1), %v2683_v27 }
 0x6ce   : > { %2692 = vst [vmem:[%s4719_s0 + $0x10] sm:$0xff] (!%p2997_p1), %v2682_v25 }
 0x6d3   : > { %v3482_v49 = vpop.f32.mrb[8].mxu1 }
 0x6d4   : > { %v2588_v0 = vadd.f32 %v3482_v49, %v4776_v58  ;;  %v2540_v2 = vpop.f32.mrb[9].mxu1 }
 0x6d5   : > { %v2586_v1 = vadd.f32 %v4776_v58, %v2540_v2  ;;  %v3483_v11 = vpop.f32.mrb[10].mxu1 }
 0x6d6   : > { %v2604_v46 = vmax.f32 %v2588_v0, 0.0  ;;  %v2589_v52 = vadd.f32 %v3483_v11, %v4776_v58  ;;  %v2543_v55 = vpop.f32.mrb[11].mxu1 }
 0x6d7   : > { %v2602_v7 = vmax.f32 %v2586_v1, 0.0  ;;  %v2587_v4 = vadd.f32 %v4776_v58, %v2543_v55 }
 0x6d8   : > { %v4827_v16 = vsel %vm2654_vm8, %v2604_v46, 0.0  ;;  %v2605_v22 = vmax.f32 %v2589_v52, 0.0 }
 0x6d9   : > { %v2668_v53 = vsel %vm2652_vm9, %v2602_v7, 0.0  ;;  %v2603_v21 = vmax.f32 %v2587_v4, 0.0 }
 0x6da   : > { %v2671_v23 = vsel %vm2655_vm10, %v2605_v22, 0.0 }
 0x6db   : > { %v2669_v10 = vsel %vm2653_vm11, %v2603_v21, 0.0  ;;  %v2685_v51 = vpack.c.bf16 (!%p2997_p1), %v2671_v23, %v4827_v16 }
 0x6dc   : > { %v2684_v63 = vpack.c.bf16 (!%p2997_p1), %v2669_v10, %v2668_v53 }
 0x6dd   : > { %2695 = vst [vmem:[%s4719_s0 + $0x28] sm:$0xff] (!%p2997_p1), %v2685_v51 }
 0x6de   : > { %2694 = vst [vmem:[%s4719_s0 + $0x20] sm:$0xff] (!%p2997_p1), %v2684_v63 }
 0x6e3   : > { %v3486_v61 = vpop.f32.mrb[12].mxu1 }
 0x6e4   : > { %v2592_v35 = vadd.f32 %v3486_v61, %v4776_v58  ;;  %v2556_v38 = vpop.f32.mrb[13].mxu1 }
 0x6e5   : > { %v2590_v9 = vadd.f32 %v4776_v58, %v2556_v38  ;;  %v3487_v39 = vpop.f32.mrb[14].mxu1  ;;  %2679 = sbr.rel (%p2997_p1) target bundleno = 1775 (0x6ef), region = 88 }
 0x6e6   : > { %v2608_v8 = vmax.f32 %v2592_v35, 0.0  ;;  %v2593_v44 = vadd.f32 %v3487_v39, %v4776_v58  ;;  %v2559_v12 = vpop.f32.mrb[15].mxu1 }
 0x6e7   : > { %v2606_v13 = vmax.f32 %v2590_v9, 0.0  ;;  %v2591_v14 = vadd.f32 %v4776_v58, %v2559_v12  ;;  %v2680_v58 = vpack.c.bf16 (!%p2997_p1), %v4793_v37, %v4789_v34 }
 0x6e8   : > { %v2674_v15 = vsel %vm2658_vm12, %v2608_v8, 0.0  ;;  %v2609_v17 = vmax.f32 %v2593_v44, 0.0 }
 0x6e9   : > { %v2672_v18 = vsel %vm2656_vm13, %v2606_v13, 0.0  ;;  %v2607_v19 = vmax.f32 %v2591_v14, 0.0  ;;  %2690 = vst [vmem:[%s4719_s0] sm:$0xff] (!%p2997_p1), %v2680_v58 }
 0x6ea   : > { %v2675_v20 = vsel %vm2659_vm14, %v2609_v17, 0.0 }
 0x6eb   : > { %v2673_v54 = vsel %vm2657_vm15, %v2607_v19, 0.0  ;;  %v2687_v42 = vpack.c.bf16 (!%p2997_p1), %v2675_v20, %v2674_v15 }
 0x6ec   : > { %v2686_v60 = vpack.c.bf16 %v2673_v54, %v2672_v18 }
 0x6ed   : > { %2697 = vst [vmem:[%s4719_s0 + $0x38] sm:$0xff] %v2687_v42 }
 0x6ee   : > { %2696 = vst [vmem:[%s4719_s0 + $0x30] sm:$0xff] %v2686_v60 }
 0x6ef PF: > { %p2999_p5 = scmp.ne.s32.totalorder %s3945_s28, 2 }
 0x6f0   : > { %s2702_s12 = scalar_lea.vmem (!%p2999_p5), [#allocation9], %s4264_s16 }
 0x6f1   : > { %2701 = sbr.rel (%p2999_p5) target bundleno = 1785 (0x6f9), region = 92  ;;  %2703 = vst [vmem:[%s2702_s12] sm:$0xff] (!%p2999_p5), %v4789_v34  ;;  %2704 = vst [vmem:[%s2702_s12 + $0x8] sm:$0xff] (!%p2999_p5), %v4793_v37 }
 0x6f2   : > { %2705 = vst [vmem:[%s2702_s12 + $0x10] sm:$0xff] (!%p2999_p5), %v4787_v32  ;;  %2706 = vst [vmem:[%s2702_s12 + $0x18] sm:$0xff] (!%p2999_p5), %v4791_v36 }
 0x6f3   : > { %2707 = vst [vmem:[%s2702_s12 + $0x20] sm:$0xff] (!%p2999_p5), %v4809_v5  ;;  %2708 = vst [vmem:[%s2702_s12 + $0x28] sm:$0xff] (!%p2999_p5), %v4813_v43 }
 0x6f4   : > { %2709 = vst [vmem:[%s2702_s12 + $0x30] sm:$0xff] (!%p2999_p5), %v4807_v56  ;;  %2710 = vst [vmem:[%s2702_s12 + $0x38] sm:$0xff] (!%p2999_p5), %v4811_v41 }
 0x6f5   : > { %2711 = vst [vmem:[%s2702_s12 + $0x40] sm:$0xff] (!%p2999_p5), %v2668_v53  ;;  %2712 = vst [vmem:[%s2702_s12 + $0x48] sm:$0xff] (!%p2999_p5), %v2669_v10 }
 0x6f6   : > { %2713 = vst [vmem:[%s2702_s12 + $0x50] sm:$0xff] (!%p2999_p5), %v4827_v16  ;;  %2714 = vst [vmem:[%s2702_s12 + $0x58] sm:$0xff] (!%p2999_p5), %v2671_v23 }
 0x6f7   : > { %2715 = vst [vmem:[%s2702_s12 + $0x60] sm:$0xff] (!%p2999_p5), %v2672_v18  ;;  %2716 = vst [vmem:[%s2702_s12 + $0x68] sm:$0xff] (!%p2999_p5), %v2673_v54 }
 0x6f8   : > { %2717 = vst [vmem:[%s2702_s12 + $0x70] sm:$0xff] %v2674_v15  ;;  %2718 = vst [vmem:[%s2702_s12 + $0x78] sm:$0xff] %v2675_v20 }
 0x6f9 PF: > { %p3562_p6 = scmp.eq.s32.totalorder %s4128_s17, 5  ;;  %s3969_s28 = smov [#allocation9]  }
 0x6fa   : > { %s2725_s16 = sshll.u32 %s3969_s28, 4  ;;  %s2726_s16 = int_to_ptr.vmem [resolvable:$true] %s2725_s16 }
 0x6fb   : > { %s3829_s15 = scalar_lea.vmem %s2726_s16, 4096  ;;  %p3836_p8 = scmp.lt.s32.totalorder %s2726_s16, %s2726_s16 }
 0x6fc   : > { %p3830_p9 = scmp.ne.s32.totalorder %s2726_s16, %s3829_s15  ;;  %p3837_p3 = scmp.lt.s32.totalorder %s3829_s15, %s3829_s15 }
 0x6fe   : > { %p3831_p11 = pnand %p3830_p9, %p3562_p6  ;;  %p3838_p7 = por %p3837_p3, %p3836_p8 }
 0x700   : > { %p3832_p13 = pneg %p3831_p11 }
 0x702   : > { %p3839_p2 = pnand %p3838_p7, %p3832_p13 }
 0x704   : > { %3842 = shalt.err (!%p3839_p2)
}
 0x705   : > { %s4970_s24 = sld [smem:[#allocation20_spill]] }
 0x70b   : > { %s4971_s6 = smov %s4970_s24  ;;  %s3843_s21 = scalar_lea.hbm %s4970_s24, 4096 }
 0x70c   : > { %p3844_p10 = scmp.ne.s32.totalorder %s4971_s6, %s3843_s21  ;;  %p3849_p4 = scmp.lt.u32.totalorder %s3843_s21, %s4971_s6 }
 0x70e   : > { %p3845_p0 = pnand %p3844_p10, %p3562_p6 }
 0x710   : > { %p3846_p12 = pneg %p3845_p0 }
 0x712   : > { %p3851_p1 = pnand %p3849_p4, %p3846_p12 }
 0x714   : > { %3854 = shalt.err (!%p3851_p1)
}
 0x715   : > { %s3970_s19 = smov 128   ;;  %s3971_s14 = smov 8  }
 0x716   : > { %3545 = dma.vmem_to_hbm [thread:$0]  (%p3562_p6), %s2726_s16, 4096, %s4971_s6, [#allocation5], %s3970_s19, %s3970_s19, %s3971_s14  }
 0x717   : > { %3912 = dma.done.wait (%p3562_p6), [#allocation5], 4096  }
 0x718   : > { %3914 = vsyncadd (%p3562_p6), [#allocation5], 4294963200 }
 0x719 PF: > { %s21_s7 = sadd.s32 1, %s3957_s7   ;;  %s4972_s0 = sld [smem:[#allocation14_spill]] }
 0x71a   : > { %p18_p5 = scmp.ge.s32.totalorder %s21_s7, 8   ;;  %s4973_s26 = sld [smem:[#allocation17_spill]] }
 0x71b   : > { %s4974_s27 = sld [smem:[#allocation15_spill]]  ;;  %s4975_s29 = sld [smem:[#allocation16_spill]] }
 0x71c   : > { %s4976_s21 = smov %s3921_s22  ;;  %s4977_s22 = smov %s3925_s23 }
 0x71d   : > { %s4978_s23 = smov %s4209_s8  ;;  %s4979_s24 = smov %s3933_s25 }
 0x71e   : > { %s4981_s28 = smov %s3953_s30  ;;  %s4982_s30 = smov %s4988_s18 }
 0x71f   : > { %s4980_s25 = smov %s4972_s0  ;;  %20 = sbr.rel (!%p18_p5) target bundleno = 12 (0xc), region = 151 }
 0x726   :  { %2741 = vsyncpa [#allocation4], 1 }
 0x727   :  { %2743 = vsyncpa [#allocation4 + $0x1], 1 }
 0x728   :  { %2744 = vsyncpa [#allocation7], 1 }
 0x729   :  { %2745 = vsyncpa [#allocation5], 1 }
 0x72a   :  { %2747 = vsyncpa [#allocation5 + $0x1], 1 }

</bundles_post_ra>
